<compile_context>
chip_gen: v7x
topology: tpu7x:2x2x1
jax: 0.10.0
libtpu: 0.0.40
codegen_flags: <defaults>
</compile_context>

<pallas_src>
import functools

import jax
import jax.numpy as jnp
from jax import lax
from jax.experimental import pallas as pl
from jax.experimental.pallas import tpu as pltpu

_LANES = 128  # vreg lane width; inner compute chunk along the batch axis


def _round_up(x, m):
    return ((x + m - 1) // m) * m


def _ldsl_kernel(objects_ref, p_ref, out_ref, *, eps, n_valid):
    """One batch-block grid step.

    objects_ref: (F, N, TB) VMEM tile, native dtype, batch on the lane axis.
    p_ref:       (N, TB)    VMEM tile, float32 "probability not empty".
    out_ref:     (1, TB)    resident float32 lane-wise loss accumulator
                 (summed by the wrapper after the grid finishes).
    """
    b = pl.program_id(0)
    n_feat, n_obj, tb = objects_ref.shape
    eps2 = jnp.float32(eps) * jnp.float32(eps)

    @pl.when(b == 0)
    def _init():
        out_ref[...] = jnp.zeros_like(out_ref)

    # Hoisted iotas (JAX does not CSE broadcast_in_dim inside loops).
    obj_idx = lax.broadcasted_iota(jnp.int32, (n_obj, _LANES), 0)   # (N, 128)
    lane_idx = lax.broadcasted_iota(jnp.int32, (1, _LANES), 1)      # (1, 128)

    n_chunks = tb // _LANES

    @pl.loop(0, n_chunks)
    def _chunk(c):
        off = pl.multiple_of(c * _LANES, _LANES)
        x = objects_ref[:, :, pl.ds(off, _LANES)].astype(jnp.float32)  # (F,N,128)
        p = p_ref[:, pl.ds(off, _LANES)]                               # (N,128)

        # Squared norms: reduction over the major F axis -> pure VPU adds.
        sq_norm = jnp.sum(x * x, axis=0)                               # (N,128)

        # Strict-upper-triangle accumulation of cos^2_ij * p_i * p_j.
        num_acc = jnp.zeros((n_obj, _LANES), jnp.float32)
        for j in range(1, n_obj):            # static, unrolled (n_obj is small)
            xj = x[:, j:j + 1, :]                                      # (F,1,128)
            gj = jnp.sum(x * xj, axis=0)                               # (N,128)
            # CosineSimilarity denom: sqrt(max(a, eps^2))^2 == max(a, eps^2),
            # so no sqrt and no extra square are needed for squared cosines.
            dj = jnp.maximum(sq_norm * sq_norm[j:j + 1, :], eps2)
            # Reciprocal on the EUP (otherwise-idle slot) + one Newton step.
            inv_dj = pl.reciprocal(dj, approx=True)
            inv_dj = inv_dj * (2.0 - dj * inv_dj)
            ppj = p * p[j:j + 1, :]
            term = gj * gj * inv_dj * ppj
            num_acc = num_acc + jnp.where(obj_idx < j, term, 0.0)

        num = jnp.sum(num_acc, axis=0, keepdims=True)                  # (1,128)

        # Closed-form pair-weight sum: sum_{i<j} p_i p_j.
        p_sum = jnp.sum(p, axis=0, keepdims=True)
        p_sq = jnp.sum(p * p, axis=0, keepdims=True)
        den = 0.5 * (p_sum * p_sum - p_sq)                             # (1,128)

        # Mask lanes past the true batch size (wrapper pads the lane axis).
        row_ids = b * tb + off + lane_idx
        contrib = jnp.where(row_ids < n_valid, num / den, 0.0)

        cur = out_ref[:, pl.ds(off, _LANES)]
        out_ref[:, pl.ds(off, _LANES)] = cur + contrib


def latent_duplicate_suppression_loss(objects, is_empty=None, *, weight=1.0,
                                      eps=1e-8, block_cols=4096):
    """JAX/Pallas equivalent of LatentDupplicateSuppressionLoss.forward."""
    if objects.ndim == 4:
        bs, n_frames, n_obj, n_feat = objects.shape
        objects = objects.reshape(bs * n_frames, n_obj, n_feat)
        if is_empty is not None:
            is_empty = is_empty.reshape(bs * n_frames, n_obj)
    elif objects.ndim != 3:
        raise ValueError("Incompatible input format.")

    batch, n_obj, n_feat = objects.shape

    if block_cols <= 0 or block_cols % _LANES != 0:
        raise ValueError("block_cols must be a positive multiple of 128.")

    if is_empty is None:
        # p == 1 everywhere: closed-form den == n_pairs, so the weighted mean
        # reduces exactly to sq_similarities.mean(dim=-1) (reference else path).
        p_not_empty = jnp.ones((n_obj, batch), jnp.float32)
    else:
        p_not_empty = 1.0 - jnp.transpose(is_empty).astype(jnp.float32)

    # Lane-dense layout: put the flattened batch on the 128-lane axis.
    objects_t = jnp.transpose(objects, (2, 1, 0))          # (F, N, B), native dtype

    # Pad the lane axis so the grid covers it with full blocks only.
    tb = min(block_cols, _round_up(batch, _LANES))
    b_pad = _round_up(batch, tb)
    pad = b_pad - batch
    if pad:
        objects_t = jnp.pad(objects_t, ((0, 0), (0, 0), (0, pad)))
        # p padded with 1.0 keeps den > 0 in padded lanes; they are also
        # masked in-kernel, so the pad value only needs to be finite.
        p_not_empty = jnp.pad(p_not_empty, ((0, 0), (0, pad)),
                              constant_values=1.0)
    nb = b_pad // tb

    kernel = functools.partial(_ldsl_kernel, eps=float(eps), n_valid=batch)

    itemsize = jnp.dtype(objects.dtype).itemsize
    cost = pl.CostEstimate(
        flops=batch * (2 * n_obj * n_feat
                       + (n_obj - 1) * (2 * n_obj * n_feat + 10 * n_obj)),
        transcendentals=batch * n_obj * (n_obj - 1),
        bytes_accessed=b_pad * (n_obj * n_feat * itemsize + n_obj * 4) + tb * 4,
    )

    partial = pl.pallas_call(
        kernel,
        out_shape=jax.ShapeDtypeStruct((1, tb), jnp.float32),
        grid=(nb,),
        in_specs=[
            pl.BlockSpec((n_feat, n_obj, tb), lambda b: (0, 0, b)),
            pl.BlockSpec((n_obj, tb), lambda b: (0, b)),
        ],
        out_specs=pl.BlockSpec((1, tb), lambda b: (0, 0)),
        compiler_params=pltpu.CompilerParams(
            dimension_semantics=("arbitrary",),
            # v7x-safe (64 MiB physical / 32 MiB scoped); supports
            # block_cols up to ~8192 in f32 with double buffering.
            vmem_limit_bytes=32 * 1024 * 1024,
        ),
        cost_estimate=cost,
    )(objects_t, p_not_empty)

    # Single cross-lane reduction of the lane-wise accumulator (XLA side).
    return weight * jnp.sum(partial) / batch


def _reference(objects, is_empty, weight, eps=1e-8):
    """Pure-JAX reference mirroring the PyTorch module (3-D path)."""
    bs, n_obj, _ = objects.shape
    objects = objects.astype(jnp.float32)
    iu = jnp.triu_indices(n_obj, k=1)
    a = objects[:, iu[0], :]
    b = objects[:, iu[1], :]
    num = jnp.sum(a * b, axis=-1)
    den = jnp.sqrt(
        jnp.maximum(jnp.sum(a * a, -1) * jnp.sum(b * b, -1), eps * eps)
    )
    sq_sim = (num / den) ** 2
    if is_empty is not None:
        p = 1.0 - is_empty.astype(jnp.float32)
        p_pair = p[..., iu[0]] * p[..., iu[1]]
        losses = sq_sim * p_pair / jnp.sum(p_pair, axis=-1, keepdims=True)
    else:
        losses = jnp.mean(sq_sim, axis=-1, keepdims=True)
    return weight * jnp.sum(losses) / bs


if __name__ == "__main__":
    key = jax.random.PRNGKey(0)
    k1, k2, k3, k4, k5, k6 = jax.random.split(key, 6)

    n_objects, n_features = 8, 32
    weight = 0.5

    # 1) 3-D path with is_empty (small batch, single block/chunk).
    objects = jax.random.normal(k1, (2, n_objects, n_features), jnp.float32)
    is_empty = jax.random.uniform(k2, (2, n_objects), dtype=jnp.float32)
    loss = latent_duplicate_suppression_loss(objects, is_empty, weight=weight)
    loss = jax.block_until_ready(loss)
    ref = _reference(objects, is_empty, weight)
    assert jnp.allclose(loss, ref, rtol=1e-4, atol=1e-6), (loss, ref)

    # 2) 3-D path, is_empty = None (plain mean over pairs).
    loss_none = latent_duplicate_suppression_loss(objects, None, weight=weight)
    loss_none = jax.block_until_ready(loss_none)
    ref_none = _reference(objects, None, weight)
    assert jnp.allclose(loss_none, ref_none, rtol=1e-4, atol=1e-6), (loss_none, ref_none)

    # 3) Multi-block + multi-chunk + padded lanes:
    #    batch=300, block_cols=256 -> tb=256 (2 lane chunks), b_pad=512, grid=(2,).
    objects_big = jax.random.normal(k3, (300, n_objects, n_features), jnp.float32)
    is_empty_big = jax.random.uniform(k4, (300, n_objects), dtype=jnp.float32)
    loss_big = latent_duplicate_suppression_loss(
        objects_big, is_empty_big, weight=weight, block_cols=256
    )
    loss_big = jax.block_until_ready(loss_big)
    ref_big = _reference(objects_big, is_empty_big, weight)
    assert jnp.allclose(loss_big, ref_big, rtol=1e-4, atol=1e-6), (loss_big, ref_big)

    # 4) 4-D path (bs, n_frames, n_obj, n_feat).
    objects4 = jax.random.normal(k5, (3, 5, n_objects, n_features), jnp.float32)
    is_empty4 = jax.random.uniform(k6, (3, 5, n_objects), dtype=jnp.float32)
    loss4 = latent_duplicate_suppression_loss(objects4, is_empty4, weight=weight)
    loss4 = jax.block_until_ready(loss4)
    ref4 = _reference(
        objects4.reshape(15, n_objects, n_features),
        is_empty4.reshape(15, n_objects),
        weight,
    )
    assert jnp.allclose(loss4, ref4, rtol=1e-4, atol=1e-6), (loss4, ref4)

    # 5) bf16 objects stay bf16 through the DMA; math is f32 in-register.
    objects_bf16 = objects_big.astype(jnp.bfloat16)
    loss_bf16 = latent_duplicate_suppression_loss(
        objects_bf16, is_empty_big, weight=weight, block_cols=256
    )
    loss_bf16 = jax.block_until_ready(loss_bf16)
    ref_bf16 = _reference(objects_bf16, is_empty_big, weight)
    assert jnp.allclose(loss_bf16, ref_bf16, rtol=1e-3, atol=1e-5), (loss_bf16, ref_bf16)

    print("KERNEL_OK")
</pallas_src>

<mosaic_0001>
module attributes {stable_mosaic.version = 11 : i64} {
  func.func @_ldsl_kernel(%arg0: i32, %arg1: memref<32x8x128xf32, #tpu.memory_space<vmem>>, %arg2: memref<8x128xf32, #tpu.memory_space<vmem>>, %arg3: memref<1x128xf32, #tpu.memory_space<vmem>>) attributes {dimension_semantics = [#tpu.dimension_semantics<arbitrary>], iteration_bounds = array<i64: 1>, scalar_prefetch = 0 : i64, scratch_operands = 0 : i64, tpu.core_type = #tpu.core_type<tc>, window_params = [{transform_indices = @transform_0, window_bounds = array<i64: 32, 8, 128>}, {transform_indices = @transform_1, window_bounds = array<i64: 8, 128>}, {pipeline_mode = #tpu.pipeline_mode<synchronous>, transform_indices = @transform_2, window_bounds = array<i64: 1, 128>}]} {
    %cst = arith.constant 9.99999993E-9 : f32
    %cst_0 = arith.constant 9.99999993E-9 : f32
    %0 = arith.mulf %cst, %cst_0 : f32
    %c0_i32 = arith.constant 0 : i32
    %1 = arith.cmpi eq, %arg0, %c0_i32 : i32
    %2 = arith.extui %1 : i1 to i32
    %c0_i32_1 = arith.constant 0 : i32
    %3 = arith.cmpi ne, %2, %c0_i32_1 : i32
    scf.if %3 {
      %cst_40 = arith.constant 0.000000e+00 : f32
      %217 = vector.broadcast %cst_40 : f32 to vector<1x128xf32>
      %c0_41 = arith.constant 0 : index
      %c0_42 = arith.constant 0 : index
      %218 = vector.load %arg3[%c0_41, %c0_42] : memref<1x128xf32, #tpu.memory_space<vmem>>, vector<1x128xf32>
      tpu.vector_store %arg3[%c0_41, %c0_42], %217 {strides = array<i32>} : memref<1x128xf32, #tpu.memory_space<vmem>>, vector<1x128xf32>,
    } else {
    }
    %4 = tpu.iota {dimensions = array<i32: 0>} : vector<8x128xi32>
    %5 = tpu.iota {dimensions = array<i32: 1>} : vector<1x128xi32>
    %c0_i32_2 = arith.constant 0 : i32
    %c1_i32 = arith.constant 1 : i32
    %6 = arith.muli %c0_i32_2, %c1_i32 : i32
    %c0_i32_3 = arith.constant 0 : i32
    %7 = arith.addi %c0_i32_3, %6 : i32
    %c128_i32 = arith.constant 128 : i32
    %8 = arith.muli %7, %c128_i32 : i32
    %9 = tpu.assume_multiple %8, 128 : i32
    %c0 = arith.constant 0 : index
    %c0_4 = arith.constant 0 : index
    %10 = arith.index_cast %9 : i32 to index
    %11 = vector.load %arg1[%c0, %c0_4, %10] : memref<32x8x128xf32, #tpu.memory_space<vmem>>, vector<32x8x128xf32>
    %c0_5 = arith.constant 0 : index
    %12 = arith.index_cast %9 : i32 to index
    %13 = vector.load %arg2[%c0_5, %12] : memref<8x128xf32, #tpu.memory_space<vmem>>, vector<8x128xf32>
    %14 = arith.mulf %11, %11 : vector<32x8x128xf32>
    %cst_6 = arith.constant dense<0.000000e+00> : vector<8x128xf32>
    %15 = vector.multi_reduction <add>, %14, %cst_6 [0] : vector<32x8x128xf32> to vector<8x128xf32>
    %cst_7 = arith.constant 0.000000e+00 : f32
    %16 = vector.broadcast %cst_7 : f32 to vector<8x128xf32>
    %17 = vector.extract_strided_slice %11 {offsets = [0, 1, 0], sizes = [32, 1, 128], strides = [1, 1, 1]} : vector<32x8x128xf32> to vector<32x1x128xf32>
    %18 = vector.broadcast %17 : vector<32x1x128xf32> to vector<32x8x128xf32>
    %19 = arith.mulf %11, %18 : vector<32x8x128xf32>
    %cst_8 = arith.constant dense<0.000000e+00> : vector<8x128xf32>
    %20 = vector.multi_reduction <add>, %19, %cst_8 [0] : vector<32x8x128xf32> to vector<8x128xf32>
    %21 = vector.extract_strided_slice %15 {offsets = [1, 0], sizes = [1, 128], strides = [1, 1]} : vector<8x128xf32> to vector<1x128xf32>
    %22 = vector.broadcast %21 : vector<1x128xf32> to vector<8x128xf32>
    %23 = arith.mulf %15, %22 : vector<8x128xf32>
    %24 = vector.broadcast %0 : f32 to vector<8x128xf32>
    %25 = arith.maximumf %23, %24 : vector<8x128xf32>
    %26 = tpu.reciprocal %25 {approx = true} : vector<8x128xf32> -> vector<8x128xf32>
    %27 = arith.mulf %25, %26 : vector<8x128xf32>
    %cst_9 = arith.constant 2.000000e+00 : f32
    %28 = vector.broadcast %cst_9 : f32 to vector<8x128xf32>
    %29 = arith.subf %28, %27 : vector<8x128xf32>
    %30 = arith.mulf %26, %29 : vector<8x128xf32>
    %31 = vector.extract_strided_slice %13 {offsets = [1, 0], sizes = [1, 128], strides = [1, 1]} : vector<8x128xf32> to vector<1x128xf32>
    %32 = vector.broadcast %31 : vector<1x128xf32> to vector<8x128xf32>
    %33 = arith.mulf %13, %32 : vector<8x128xf32>
    %34 = arith.mulf %20, %20 : vector<8x128xf32>
    %35 = arith.mulf %34, %30 : vector<8x128xf32>
    %36 = arith.mulf %35, %33 : vector<8x128xf32>
    %c1_i32_10 = arith.constant 1 : i32
    %37 = vector.broadcast %c1_i32_10 : i32 to vector<8x128xi32>
    %38 = arith.cmpi slt, %4, %37 : vector<8x128xi32>
    %cst_11 = arith.constant 0.000000e+00 : f32
    %39 = vector.broadcast %cst_11 : f32 to vector<8x128xf32>
    %40 = arith.select %38, %36, %39 : vector<8x128xi1>, vector<8x128xf32>
    %41 = arith.addf %16, %40 : vector<8x128xf32>
    %42 = vector.extract_strided_slice %11 {offsets = [0, 2, 0], sizes = [32, 1, 128], strides = [1, 1, 1]} : vector<32x8x128xf32> to vector<32x1x128xf32>
    %43 = vector.broadcast %42 : vector<32x1x128xf32> to vector<32x8x128xf32>
    %44 = arith.mulf %11, %43 : vector<32x8x128xf32>
    %cst_12 = arith.constant dense<0.000000e+00> : vector<8x128xf32>
    %45 = vector.multi_reduction <add>, %44, %cst_12 [0] : vector<32x8x128xf32> to vector<8x128xf32>
    %46 = vector.extract_strided_slice %15 {offsets = [2, 0], sizes = [1, 128], strides = [1, 1]} : vector<8x128xf32> to vector<1x128xf32>
    %47 = vector.broadcast %46 : vector<1x128xf32> to vector<8x128xf32>
    %48 = arith.mulf %15, %47 : vector<8x128xf32>
    %49 = vector.broadcast %0 : f32 to vector<8x128xf32>
    %50 = arith.maximumf %48, %49 : vector<8x128xf32>
    %51 = tpu.reciprocal %50 {approx = true} : vector<8x128xf32> -> vector<8x128xf32>
    %52 = arith.mulf %50, %51 : vector<8x128xf32>
    %cst_13 = arith.constant 2.000000e+00 : f32
    %53 = vector.broadcast %cst_13 : f32 to vector<8x128xf32>
    %54 = arith.subf %53, %52 : vector<8x128xf32>
    %55 = arith.mulf %51, %54 : vector<8x128xf32>
    %56 = vector.extract_strided_slice %13 {offsets = [2, 0], sizes = [1, 128], strides = [1, 1]} : vector<8x128xf32> to vector<1x128xf32>
    %57 = vector.broadcast %56 : vector<1x128xf32> to vector<8x128xf32>
    %58 = arith.mulf %13, %57 : vector<8x128xf32>
    %59 = arith.mulf %45, %45 : vector<8x128xf32>
    %60 = arith.mulf %59, %55 : vector<8x128xf32>
    %61 = arith.mulf %60, %58 : vector<8x128xf32>
    %c2_i32 = arith.constant 2 : i32
    %62 = vector.broadcast %c2_i32 : i32 to vector<8x128xi32>
    %63 = arith.cmpi slt, %4, %62 : vector<8x128xi32>
    %cst_14 = arith.constant 0.000000e+00 : f32
    %64 = vector.broadcast %cst_14 : f32 to vector<8x128xf32>
    %65 = arith.select %63, %61, %64 : vector<8x128xi1>, vector<8x128xf32>
    %66 = arith.addf %41, %65 : vector<8x128xf32>
    %67 = vector.extract_strided_slice %11 {offsets = [0, 3, 0], sizes = [32, 1, 128], strides = [1, 1, 1]} : vector<32x8x128xf32> to vector<32x1x128xf32>
    %68 = vector.broadcast %67 : vector<32x1x128xf32> to vector<32x8x128xf32>
    %69 = arith.mulf %11, %68 : vector<32x8x128xf32>
    %cst_15 = arith.constant dense<0.000000e+00> : vector<8x128xf32>
    %70 = vector.multi_reduction <add>, %69, %cst_15 [0] : vector<32x8x128xf32> to vector<8x128xf32>
    %71 = vector.extract_strided_slice %15 {offsets = [3, 0], sizes = [1, 128], strides = [1, 1]} : vector<8x128xf32> to vector<1x128xf32>
    %72 = vector.broadcast %71 : vector<1x128xf32> to vector<8x128xf32>
    %73 = arith.mulf %15, %72 : vector<8x128xf32>
    %74 = vector.broadcast %0 : f32 to vector<8x128xf32>
    %75 = arith.maximumf %73, %74 : vector<8x128xf32>
    %76 = tpu.reciprocal %75 {approx = true} : vector<8x128xf32> -> vector<8x128xf32>
    %77 = arith.mulf %75, %76 : vector<8x128xf32>
    %cst_16 = arith.constant 2.000000e+00 : f32
    %78 = vector.broadcast %cst_16 : f32 to vector<8x128xf32>
    %79 = arith.subf %78, %77 : vector<8x128xf32>
    %80 = arith.mulf %76, %79 : vector<8x128xf32>
    %81 = vector.extract_strided_slice %13 {offsets = [3, 0], sizes = [1, 128], strides = [1, 1]} : vector<8x128xf32> to vector<1x128xf32>
    %82 = vector.broadcast %81 : vector<1x128xf32> to vector<8x128xf32>
    %83 = arith.mulf %13, %82 : vector<8x128xf32>
    %84 = arith.mulf %70, %70 : vector<8x128xf32>
    %85 = arith.mulf %84, %80 : vector<8x128xf32>
    %86 = arith.mulf %85, %83 : vector<8x128xf32>
    %c3_i32 = arith.constant 3 : i32
    %87 = vector.broadcast %c3_i32 : i32 to vector<8x128xi32>
    %88 = arith.cmpi slt, %4, %87 : vector<8x128xi32>
    %cst_17 = arith.constant 0.000000e+00 : f32
    %89 = vector.broadcast %cst_17 : f32 to vector<8x128xf32>
    %90 = arith.select %88, %86, %89 : vector<8x128xi1>, vector<8x128xf32>
    %91 = arith.addf %66, %90 : vector<8x128xf32>
    %92 = vector.extract_strided_slice %11 {offsets = [0, 4, 0], sizes = [32, 1, 128], strides = [1, 1, 1]} : vector<32x8x128xf32> to vector<32x1x128xf32>
    %93 = vector.broadcast %92 : vector<32x1x128xf32> to vector<32x8x128xf32>
    %94 = arith.mulf %11, %93 : vector<32x8x128xf32>
    %cst_18 = arith.constant dense<0.000000e+00> : vector<8x128xf32>
    %95 = vector.multi_reduction <add>, %94, %cst_18 [0] : vector<32x8x128xf32> to vector<8x128xf32>
    %96 = vector.extract_strided_slice %15 {offsets = [4, 0], sizes = [1, 128], strides = [1, 1]} : vector<8x128xf32> to vector<1x128xf32>
    %97 = vector.broadcast %96 : vector<1x128xf32> to vector<8x128xf32>
    %98 = arith.mulf %15, %97 : vector<8x128xf32>
    %99 = vector.broadcast %0 : f32 to vector<8x128xf32>
    %100 = arith.maximumf %98, %99 : vector<8x128xf32>
    %101 = tpu.reciprocal %100 {approx = true} : vector<8x128xf32> -> vector<8x128xf32>
    %102 = arith.mulf %100, %101 : vector<8x128xf32>
    %cst_19 = arith.constant 2.000000e+00 : f32
    %103 = vector.broadcast %cst_19 : f32 to vector<8x128xf32>
    %104 = arith.subf %103, %102 : vector<8x128xf32>
    %105 = arith.mulf %101, %104 : vector<8x128xf32>
    %106 = vector.extract_strided_slice %13 {offsets = [4, 0], sizes = [1, 128], strides = [1, 1]} : vector<8x128xf32> to vector<1x128xf32>
    %107 = vector.broadcast %106 : vector<1x128xf32> to vector<8x128xf32>
    %108 = arith.mulf %13, %107 : vector<8x128xf32>
    %109 = arith.mulf %95, %95 : vector<8x128xf32>
    %110 = arith.mulf %109, %105 : vector<8x128xf32>
    %111 = arith.mulf %110, %108 : vector<8x128xf32>
    %c4_i32 = arith.constant 4 : i32
    %112 = vector.broadcast %c4_i32 : i32 to vector<8x128xi32>
    %113 = arith.cmpi slt, %4, %112 : vector<8x128xi32>
    %cst_20 = arith.constant 0.000000e+00 : f32
    %114 = vector.broadcast %cst_20 : f32 to vector<8x128xf32>
    %115 = arith.select %113, %111, %114 : vector<8x128xi1>, vector<8x128xf32>
    %116 = arith.addf %91, %115 : vector<8x128xf32>
    %117 = vector.extract_strided_slice %11 {offsets = [0, 5, 0], sizes = [32, 1, 128], strides = [1, 1, 1]} : vector<32x8x128xf32> to vector<32x1x128xf32>
    %118 = vector.broadcast %117 : vector<32x1x128xf32> to vector<32x8x128xf32>
    %119 = arith.mulf %11, %118 : vector<32x8x128xf32>
    %cst_21 = arith.constant dense<0.000000e+00> : vector<8x128xf32>
    %120 = vector.multi_reduction <add>, %119, %cst_21 [0] : vector<32x8x128xf32> to vector<8x128xf32>
    %121 = vector.extract_strided_slice %15 {offsets = [5, 0], sizes = [1, 128], strides = [1, 1]} : vector<8x128xf32> to vector<1x128xf32>
    %122 = vector.broadcast %121 : vector<1x128xf32> to vector<8x128xf32>
    %123 = arith.mulf %15, %122 : vector<8x128xf32>
    %124 = vector.broadcast %0 : f32 to vector<8x128xf32>
    %125 = arith.maximumf %123, %124 : vector<8x128xf32>
    %126 = tpu.reciprocal %125 {approx = true} : vector<8x128xf32> -> vector<8x128xf32>
    %127 = arith.mulf %125, %126 : vector<8x128xf32>
    %cst_22 = arith.constant 2.000000e+00 : f32
    %128 = vector.broadcast %cst_22 : f32 to vector<8x128xf32>
    %129 = arith.subf %128, %127 : vector<8x128xf32>
    %130 = arith.mulf %126, %129 : vector<8x128xf32>
    %131 = vector.extract_strided_slice %13 {offsets = [5, 0], sizes = [1, 128], strides = [1, 1]} : vector<8x128xf32> to vector<1x128xf32>
    %132 = vector.broadcast %131 : vector<1x128xf32> to vector<8x128xf32>
    %133 = arith.mulf %13, %132 : vector<8x128xf32>
    %134 = arith.mulf %120, %120 : vector<8x128xf32>
    %135 = arith.mulf %134, %130 : vector<8x128xf32>
    %136 = arith.mulf %135, %133 : vector<8x128xf32>
    %c5_i32 = arith.constant 5 : i32
    %137 = vector.broadcast %c5_i32 : i32 to vector<8x128xi32>
    %138 = arith.cmpi slt, %4, %137 : vector<8x128xi32>
    %cst_23 = arith.constant 0.000000e+00 : f32
    %139 = vector.broadcast %cst_23 : f32 to vector<8x128xf32>
    %140 = arith.select %138, %136, %139 : vector<8x128xi1>, vector<8x128xf32>
    %141 = arith.addf %116, %140 : vector<8x128xf32>
    %142 = vector.extract_strided_slice %11 {offsets = [0, 6, 0], sizes = [32, 1, 128], strides = [1, 1, 1]} : vector<32x8x128xf32> to vector<32x1x128xf32>
    %143 = vector.broadcast %142 : vector<32x1x128xf32> to vector<32x8x128xf32>
    %144 = arith.mulf %11, %143 : vector<32x8x128xf32>
    %cst_24 = arith.constant dense<0.000000e+00> : vector<8x128xf32>
    %145 = vector.multi_reduction <add>, %144, %cst_24 [0] : vector<32x8x128xf32> to vector<8x128xf32>
    %146 = vector.extract_strided_slice %15 {offsets = [6, 0], sizes = [1, 128], strides = [1, 1]} : vector<8x128xf32> to vector<1x128xf32>
    %147 = vector.broadcast %146 : vector<1x128xf32> to vector<8x128xf32>
    %148 = arith.mulf %15, %147 : vector<8x128xf32>
    %149 = vector.broadcast %0 : f32 to vector<8x128xf32>
    %150 = arith.maximumf %148, %149 : vector<8x128xf32>
    %151 = tpu.reciprocal %150 {approx = true} : vector<8x128xf32> -> vector<8x128xf32>
    %152 = arith.mulf %150, %151 : vector<8x128xf32>
    %cst_25 = arith.constant 2.000000e+00 : f32
    %153 = vector.broadcast %cst_25 : f32 to vector<8x128xf32>
    %154 = arith.subf %153, %152 : vector<8x128xf32>
    %155 = arith.mulf %151, %154 : vector<8x128xf32>
    %156 = vector.extract_strided_slice %13 {offsets = [6, 0], sizes = [1, 128], strides = [1, 1]} : vector<8x128xf32> to vector<1x128xf32>
    %157 = vector.broadcast %156 : vector<1x128xf32> to vector<8x128xf32>
    %158 = arith.mulf %13, %157 : vector<8x128xf32>
    %159 = arith.mulf %145, %145 : vector<8x128xf32>
    %160 = arith.mulf %159, %155 : vector<8x128xf32>
    %161 = arith.mulf %160, %158 : vector<8x128xf32>
    %c6_i32 = arith.constant 6 : i32
    %162 = vector.broadcast %c6_i32 : i32 to vector<8x128xi32>
    %163 = arith.cmpi slt, %4, %162 : vector<8x128xi32>
    %cst_26 = arith.constant 0.000000e+00 : f32
    %164 = vector.broadcast %cst_26 : f32 to vector<8x128xf32>
    %165 = arith.select %163, %161, %164 : vector<8x128xi1>, vector<8x128xf32>
    %166 = arith.addf %141, %165 : vector<8x128xf32>
    %167 = vector.extract_strided_slice %11 {offsets = [0, 7, 0], sizes = [32, 1, 128], strides = [1, 1, 1]} : vector<32x8x128xf32> to vector<32x1x128xf32>
    %168 = vector.broadcast %167 : vector<32x1x128xf32> to vector<32x8x128xf32>
    %169 = arith.mulf %11, %168 : vector<32x8x128xf32>
    %cst_27 = arith.constant dense<0.000000e+00> : vector<8x128xf32>
    %170 = vector.multi_reduction <add>, %169, %cst_27 [0] : vector<32x8x128xf32> to vector<8x128xf32>
    %171 = vector.extract_strided_slice %15 {offsets = [7, 0], sizes = [1, 128], strides = [1, 1]} : vector<8x128xf32> to vector<1x128xf32>
    %172 = vector.broadcast %171 : vector<1x128xf32> to vector<8x128xf32>
    %173 = arith.mulf %15, %172 : vector<8x128xf32>
    %174 = vector.broadcast %0 : f32 to vector<8x128xf32>
    %175 = arith.maximumf %173, %174 : vector<8x128xf32>
    %176 = tpu.reciprocal %175 {approx = true} : vector<8x128xf32> -> vector<8x128xf32>
    %177 = arith.mulf %175, %176 : vector<8x128xf32>
    %cst_28 = arith.constant 2.000000e+00 : f32
    %178 = vector.broadcast %cst_28 : f32 to vector<8x128xf32>
    %179 = arith.subf %178, %177 : vector<8x128xf32>
    %180 = arith.mulf %176, %179 : vector<8x128xf32>
    %181 = vector.extract_strided_slice %13 {offsets = [7, 0], sizes = [1, 128], strides = [1, 1]} : vector<8x128xf32> to vector<1x128xf32>
    %182 = vector.broadcast %181 : vector<1x128xf32> to vector<8x128xf32>
    %183 = arith.mulf %13, %182 : vector<8x128xf32>
    %184 = arith.mulf %170, %170 : vector<8x128xf32>
    %185 = arith.mulf %184, %180 : vector<8x128xf32>
    %186 = arith.mulf %185, %183 : vector<8x128xf32>
    %c7_i32 = arith.constant 7 : i32
    %187 = vector.broadcast %c7_i32 : i32 to vector<8x128xi32>
    %188 = arith.cmpi slt, %4, %187 : vector<8x128xi32>
    %cst_29 = arith.constant 0.000000e+00 : f32
    %189 = vector.broadcast %cst_29 : f32 to vector<8x128xf32>
    %190 = arith.select %188, %186, %189 : vector<8x128xi1>, vector<8x128xf32>
    %191 = arith.addf %166, %190 : vector<8x128xf32>
    %cst_30 = arith.constant dense<0.000000e+00> : vector<128xf32>
    %192 = vector.multi_reduction <add>, %191, %cst_30 [0] : vector<8x128xf32> to vector<128xf32>
    %193 = vector.shape_cast %192 : vector<128xf32> to vector<1x128xf32>
    %cst_31 = arith.constant dense<0.000000e+00> : vector<128xf32>
    %194 = vector.multi_reduction <add>, %13, %cst_31 [0] : vector<8x128xf32> to vector<128xf32>
    %195 = vector.shape_cast %194 : vector<128xf32> to vector<1x128xf32>
    %196 = arith.mulf %13, %13 : vector<8x128xf32>
    %cst_32 = arith.constant dense<0.000000e+00> : vector<128xf32>
    %197 = vector.multi_reduction <add>, %196, %cst_32 [0] : vector<8x128xf32> to vector<128xf32>
    %198 = vector.shape_cast %197 : vector<128xf32> to vector<1x128xf32>
    %199 = arith.mulf %195, %195 : vector<1x128xf32>
    %200 = arith.subf %199, %198 : vector<1x128xf32>
    %cst_33 = arith.constant 5.000000e-01 : f32
    %201 = vector.broadcast %cst_33 : f32 to vector<1x128xf32>
    %202 = arith.mulf %201, %200 : vector<1x128xf32>
    %c128_i32_34 = arith.constant 128 : i32
    %203 = arith.muli %arg0, %c128_i32_34 : i32
    %204 = arith.addi %203, %9 : i32
    %205 = vector.broadcast %204 : i32 to vector<1x128xi32>
    %206 = arith.addi %205, %5 : vector<1x128xi32>
    %c2_i32_35 = arith.constant 2 : i32
    %207 = vector.broadcast %c2_i32_35 : i32 to vector<1x128xi32>
    %208 = arith.cmpi slt, %206, %207 : vector<1x128xi32>
    %209 = arith.divf %193, %202 : vector<1x128xf32>
    %cst_36 = arith.constant 0.000000e+00 : f32
    %210 = vector.broadcast %cst_36 : f32 to vector<1x128xf32>
    %211 = arith.select %208, %209, %210 : vector<1x128xi1>, vector<1x128xf32>
    %c0_37 = arith.constant 0 : index
    %212 = arith.index_cast %9 : i32 to index
    %213 = vector.load %arg3[%c0_37, %212] : memref<1x128xf32, #tpu.memory_space<vmem>>, vector<1x128xf32>
    %214 = arith.addf %213, %211 : vector<1x128xf32>
    %c0_38 = arith.constant 0 : index
    %215 = arith.index_cast %9 : i32 to index
    %216 = vector.load %arg3[%c0_38, %215] : memref<1x128xf32, #tpu.memory_space<vmem>>, vector<1x128xf32>
    tpu.vector_store %arg3[%c0_38, %215], %214 {strides = array<i32>} : memref<1x128xf32, #tpu.memory_space<vmem>>, vector<1x128xf32>,
    %c1_i32_39 = arith.constant 1 : i32
    return
  }
  func.func @transform_0(%arg0: i32) -> (i32, i32, i32) {
    %c0_i32 = arith.constant 0 : i32
    %c0_i32_0 = arith.constant 0 : i32
    %c0_i32_1 = arith.constant 0 : i32
    return %c0_i32, %c0_i32_0, %arg0 : i32, i32, i32
  }
  func.func @transform_1(%arg0: i32) -> (i32, i32) {
    %c0_i32 = arith.constant 0 : i32
    %c0_i32_0 = arith.constant 0 : i32
    return %c0_i32, %arg0 : i32, i32
  }
  func.func @transform_2(%arg0: i32) -> (i32, i32) {
    %c0_i32 = arith.constant 0 : i32
    %c0_i32_0 = arith.constant 0 : i32
    %c0_i32_1 = arith.constant 0 : i32
    return %c0_i32, %c0_i32_0 : i32, i32
  }
}

</mosaic_0001>

<bundles_post_ra>
// kernel: tpu_custom_call.1
= control target key start
LH: loop header
LB: loop body
LE: loop exit
PB: predicated region body
PF: predicated region fallthrough
CT: control target
= control target key end

     0   :  { %7 = vsyncpa [#allocation3], 0  ;;  %s2894_s0 = inlined_call_operand.hbm [shape: f32[32,8,128], index: 0, kind: input, shape index: {}]   ;;  %s2895_s1 = inlined_call_operand.hbm [shape: f32[8,128], index: 1, kind: input, shape index: {}]   ;;  %s2896_s2 = inlined_call_operand.hbm [shape: f32[1,128], index: 2, kind: output, shape index: {}]  }
   0x1   :  { %8 = vsyncpa [#allocation6], 0 }
   0x2   :  { %9 = vsyncpa [#allocation4], 0  ;;  %s1803_s9 = smov [#allocation2]   ;;  %s1731_s13 = scalar_lea.hbm %s2894_s0, 4096 }
   0x3   :  { %s15_s10 = sshll.u32 %s1803_s9, 4  ;;  %p1732_p0 = scmp.ne.s32.totalorder %s2894_s0, %s1731_s13  ;;  %s16_s10 = int_to_ptr.vmem [resolvable:$true] %s15_s10 }
   0x4   :  { %p1735_p1 = scmp.lt.u32.totalorder %s1731_s13, %s2894_s0 }
   0x6   :  { %p1737_p2 = pnand %p1735_p1, %p1732_p0 }
   0x8   :  { %1740 = shalt.err (!%p1737_p2)
}
   0x9   :  { %s1741_s18 = scalar_lea.vmem %s16_s10, 4096  ;;  %p1746_p4 = scmp.lt.s32.totalorder %s16_s10, %s16_s10 }
   0xa   :  { %p1742_p3 = scmp.ne.s32.totalorder %s16_s10, %s1741_s18  ;;  %p1747_p5 = scmp.lt.s32.totalorder %s1741_s18, %s1741_s18 }
   0xc   :  { %p1748_p6 = por %p1747_p5, %p1746_p4 }
   0xe   :  { %p1749_p7 = pnand %p1748_p6, %p1742_p3 }
  0x10   :  { %1752 = shalt.err (!%p1749_p7)
}
  0x11   :  { %s1804_s19 = smov 128   ;;  %s1805_s20 = smov 8  }
  0x12   :  { %21 = dma.hbm_to_vmem [thread:$0]  %s2894_s0, 4096, %s16_s10, [#allocation3], %s1804_s19, %s1804_s19, %s1805_s20  }
  0x13   :  { %s1806_s23 = smov [#allocation5]   ;;  %s1753_s27 = scalar_lea.hbm %s2895_s1, 128 }
  0x14   :  { %s28_s24 = sshll.u32 %s1806_s23, 4  ;;  %p1754_p8 = scmp.ne.s32.totalorder %s2895_s1, %s1753_s27  ;;  %s29_s24 = int_to_ptr.vmem [resolvable:$true] %s28_s24 }
  0x15   :  { %p1757_p9 = scmp.lt.u32.totalorder %s1753_s27, %s2895_s1 }
  0x17   :  { %p1759_p10 = pnand %p1757_p9, %p1754_p8 }
  0x19   :  { %1762 = shalt.err (!%p1759_p10)
}
  0x1a   :  { %s1763_s4 = scalar_lea.vmem %s29_s24, 128  ;;  %p1768_p12 = scmp.lt.s32.totalorder %s29_s24, %s29_s24 }
  0x1b   :  { %p1764_p11 = scmp.ne.s32.totalorder %s29_s24, %s1763_s4  ;;  %p1769_p13 = scmp.lt.s32.totalorder %s1763_s4, %s1763_s4 }
  0x1d   :  { %p1770_p0 = por %p1769_p13, %p1768_p12 }
  0x1f   :  { %p1771_p1 = pnand %p1770_p0, %p1764_p11 }
  0x21   :  { %1774 = shalt.err (!%p1771_p1)
}
  0x22   :  { %31 = dma.hbm_to_vmem [thread:$0]  %s2895_s1, 128, %s29_s24, [#allocation6]  }
  0x23   :  { %1797 = dma.done.wait [#allocation3], 4096  }
  0x24   :  { %1798 = vsyncadd [#allocation3], 4294963200 }
  0x25   :  { %1799 = dma.done.wait [#allocation6], 128  }
  0x26   :  { %1800 = vsyncadd [#allocation6], 4294967168  ;;  %v1807_v0 = vmov 0.0   ;;  %v1848_v1 = vld [vmem:[#allocation2] sm:$0xff]  ;;  %v1850_v2 = vld [vmem:[#allocation2 + $0x8] sm:$0xff]  ;;  %v2897_v17 = vlaneseq  ;;  %s1808_s1 = smov [#allocation7]  }
  0x27   :  { %42 = vst [vmem:[#allocation7] sm:$0x1] %v1807_v0  ;;  %v1852_v3 = vld [vmem:[#allocation2 + $0x10] sm:$0xff]  ;;  %v1854_v4 = vld [vmem:[#allocation2 + $0x18] sm:$0xff]  ;;  %v80_v5 = vmul.f32 %v1848_v1, %v1848_v1  ;;  %v81_v6 = vmul.f32 %v1850_v2, %v1850_v2  ;;  %v1862_v8 = vld [vmem:[#allocation2 + $0x20] sm:$0xff]  ;;  %s1666_s6 = sshll.u32 %s1808_s1, 4  ;;  %s1667_s6 = int_to_ptr.vmem [resolvable:$true] %s1666_s6 }
  0x28   :  { %2932 = vst [vmem:[#allocation11_spill] sm:$0xff] %v1852_v3  ;;  %2933 = vst [vmem:[#allocation12_spill] sm:$0xff] %v1854_v4  ;;  %v82_v7 = vmul.f32 %v1852_v3, %v1852_v3  ;;  %v83_v9 = vmul.f32 %v1854_v4, %v1854_v4  ;;  %v1866_v11 = vld [vmem:[#allocation2 + $0x28] sm:$0xff]  ;;  %v84_v12 = vmul.f32 %v1862_v8, %v1862_v8  ;;  %v1870_v14 = vld [vmem:[#allocation2 + $0x30] sm:$0xff]  ;;  %v1883_v24 = vshrl.u32 %v2897_v17, 7  ;;  %s1775_s7 = scalar_lea.vmem %s1667_s6, 16  ;;  %p1780_p3 = scmp.lt.s32.totalorder %s1667_s6, %s1667_s6 }
  0x29   :  { %v112_v10 = vadd.f32 %v81_v6, %v80_v5  ;;  %2934 = vst [vmem:[#allocation13_spill] sm:$0xff] %v1866_v11  ;;  %v85_v15 = vmul.f32 %v1866_v11, %v1866_v11  ;;  %v1874_v18 = vld [vmem:[#allocation2 + $0x38] sm:$0xff]  ;;  %v86_v19 = vmul.f32 %v1870_v14, %v1870_v14  ;;  %v1878_v21 = vld [vmem:[#allocation2 + $0x40] sm:$0xff]  ;;  %v1885_v25 = vld [vmem:[#allocation2 + $0x48] sm:$0xff]  ;;  %p1776_p2 = scmp.ne.s32.totalorder %s1667_s6, %s1775_s7  ;;  %s1779_s8 = scalar_lea.vmem %s1667_s6, 32 }
  0x2a   :  { %2935 = vst [vmem:[#allocation14_spill] sm:$0xff] %v1874_v18  ;;  %2936 = vst [vmem:[#allocation15_spill] sm:$0xff] %v1878_v21  ;;  %v87_v22 = vmul.f32 %v1874_v18, %v1874_v18  ;;  %v88_v26 = vmul.f32 %v1878_v21, %v1878_v21  ;;  %v1889_v28 = vld [vmem:[#allocation2 + $0x50] sm:$0xff]  ;;  %v89_v29 = vmul.f32 %v1885_v25, %v1885_v25  ;;  %v1893_v31 = vld [vmem:[#allocation2 + $0x58] sm:$0xff]  ;;  %v1896_v32 = vsub.s32 1, %v1883_v24  ;;  %p1781_p4 = scmp.lt.s32.totalorder %s1779_s8, %s1775_s7 }
  0x2b   :  { %v113_v13 = vadd.f32 %v112_v10, %v82_v7  ;;  %2937 = vst [vmem:[#allocation16_spill] sm:$0xff] %v1883_v24  ;;  %2938 = vst [vmem:[#allocation17_spill] sm:$0xff] %v1885_v25  ;;  %v90_v33 = vmul.f32 %v1889_v28, %v1889_v28  ;;  %v1900_v35 = vld [vmem:[#allocation2 + $0x60] sm:$0xff]  ;;  %v91_v36 = vmul.f32 %v1893_v31, %v1893_v31  ;;  %v1904_v38 = vld [vmem:[#allocation2 + $0x68] sm:$0xff] }
  0x2c   :  { %v146_v39 = vrot.slane %v1848_v1, %v1896_v32  ;;  %v150_v40 = vrot.slane %v1850_v2, %v1896_v32  ;;  %v92_v41 = vmul.f32 %v1900_v35, %v1900_v35  ;;  %v1912_v43 = vld [vmem:[#allocation2 + $0x70] sm:$0xff]  ;;  %v154_v44 = vrot.slane %v1852_v3, %v1896_v32  ;;  %v1918_v47 = vld [vmem:[#allocation2 + $0x78] sm:$0xff]  ;;  %v1926_v53 = vld [vmem:[#allocation2 + $0x80] sm:$0xff]  ;;  %p1782_p5 = por %p1781_p4, %p1780_p3 }
  0x2d   :  { %v114_v16 = vadd.f32 %v113_v13, %v83_v9  ;;  %2939 = vst [vmem:[#allocation18_spill] sm:$0xff] %v1912_v43  ;;  %v93_v45 = vmul.f32 %v1904_v38, %v1904_v38  ;;  %2940 = vst [vmem:[#allocation19_spill] sm:$0xff] %v1918_v47  ;;  %v158_v48 = vrot.slane %v1854_v4, %v1896_v32  ;;  %v1933_v58 = vld [vmem:[#allocation2 + $0x88] sm:$0xff]  ;;  %v1940_v0 = vld [vmem:[#allocation2 + $0x90] sm:$0xff] }
  0x2e   :  { %v271_v49 = vmul.f32 %v146_v39, %v1848_v1  ;;  %v272_v50 = vmul.f32 %v150_v40, %v1850_v2  ;;  %v94_v51 = vmul.f32 %v1912_v43, %v1912_v43  ;;  %v162_v54 = vrot.slane %v1862_v8, %v1896_v32  ;;  %v1966_v39 = vld [vmem:[#allocation2 + $0xb0] sm:$0xff]  ;;  %p1783_p6 = pnand %p1782_p5, %p1776_p2 }
  0x2f   :  { %v115_v20 = vadd.f32 %v114_v16, %v84_v12  ;;  %v273_v55 = vmul.f32 %v154_v44, %v1852_v3  ;;  %v95_v56 = vmul.f32 %v1918_v47, %v1918_v47  ;;  %v166_v59 = vrot.slane %v1866_v11, %v1896_v32  ;;  %v1947_v12 = vld [vmem:[#allocation2 + $0x98] sm:$0xff]  ;;  %v1972_v44 = vld [vmem:[#allocation2 + $0xc0] sm:$0xff] }
  0x30   :  { %v274_v60 = vmul.f32 %v158_v48, %v1854_v4  ;;  %v303_v61 = vadd.f32 %v272_v50, %v271_v49  ;;  %v96_v62 = vmul.f32 %v1926_v53, %v1926_v53  ;;  %v170_v5 = vrot.slane %v1870_v14, %v1896_v32 }
  0x31   :  { %v116_v23 = vadd.f32 %v115_v20, %v85_v15  ;;  %v275_v6 = vmul.f32 %v162_v54, %v1862_v8  ;;  %v97_v9 = vmul.f32 %v1933_v58, %v1933_v58  ;;  %v174_v13 = vrot.slane %v1874_v18, %v1896_v32 }
  0x32   :  { %v304_v7 = vadd.f32 %v303_v61, %v273_v55  ;;  %v276_v15 = vmul.f32 %v166_v59, %v1866_v11  ;;  %v1978_v49 = vsub.s32 2, %v1883_v24  ;;  %v1986_v54 = vsub.s32 4, %v1883_v24  ;;  %v1988_v55 = vld [vmem:[#allocation2 + $0xc8] sm:$0xff] }
  0x33   :  { %v117_v27 = vadd.f32 %v116_v23, %v86_v19  ;;  %v98_v19 = vmul.f32 %v1940_v0, %v1940_v0  ;;  %v178_v23 = vrot.slane %v1878_v21, %v1896_v32  ;;  %v102_v59 = vmul.f32 %v1966_v39, %v1966_v39 }
  0x34   :  { %v305_v16 = vadd.f32 %v304_v7, %v274_v60  ;;  %2941 = vst [vmem:[#allocation20_spill] sm:$0xff] %v1986_v54  ;;  %v190_v60 = vrot.slane %v1893_v31, %v1896_v32  ;;  %v194_v7 = vrot.slane %v1900_v35, %v1896_v32  ;;  %v210_v17 = vrot.slane %v1926_v53, %v1896_v32 }
  0x35   :  { %v118_v30 = vadd.f32 %v117_v27, %v87_v22  ;;  %v1954_v22 = vld [vmem:[#allocation2 + $0xa0] sm:$0xff]  ;;  %v218_v54 = vrot.slane %v1940_v0, %v1896_v32 }
  0x36   :  { %v306_v27 = vadd.f32 %v305_v16, %v275_v6  ;;  %v100_v40 = vmul.f32 %v1954_v22, %v1954_v22  ;;  %v362_v16 = vrot.slane %v1850_v2, %v1978_v49 }
  0x37   :  { %v119_v34 = vadd.f32 %v118_v30, %v88_v26  ;;  %v277_v26 = vmul.f32 %v170_v5, %v1870_v14  ;;  %v104_v5 = vmul.f32 %v1972_v44, %v1972_v44 }
  0x39   :  { %v120_v37 = vadd.f32 %v119_v34, %v89_v29  ;;  %v99_v29 = vmul.f32 %v1947_v12, %v1947_v12  ;;  %v182_v34 = vrot.slane %v1885_v25, %v1896_v32 }
  0x3b   :  { %v121_v42 = vadd.f32 %v120_v37, %v90_v33  ;;  %v1961_v33 = vld [vmem:[#allocation2 + $0xa8] sm:$0xff]  ;;  %v307_v37 = vadd.f32 %v306_v27, %v276_v15  ;;  %v280_v61 = vmul.f32 %v182_v34, %v1885_v25  ;;  %v358_v15 = vrot.slane %v1848_v1, %v1978_v49 }
  0x3c   :  { %v101_v50 = vmul.f32 %v1961_v33, %v1961_v33  ;;  %v2018_v27 = vld [vmem:[#allocation2 + $0xe8] sm:$0xff]  ;;  %v282_v34 = vmul.f32 %v190_v60, %v1893_v31 }
  0x3d   :  { %v122_v46 = vadd.f32 %v121_v42, %v91_v36  ;;  %v278_v36 = vmul.f32 %v174_v13, %v1874_v18  ;;  %v1970_v42 = vld [vmem:[#allocation2 + $0xb8] sm:$0xff]  ;;  %v308_v48 = vadd.f32 %v307_v37, %v277_v26  ;;  %v366_v37 = vrot.slane %v1852_v3, %v1978_v49 }
  0x3e   :  { %v483_v60 = vmul.f32 %v358_v15, %v1848_v1 }
  0x3f   :  { %v123_v52 = vadd.f32 %v122_v46, %v92_v41  ;;  %v279_v46 = vmul.f32 %v178_v23, %v1878_v21  ;;  %v485_v15 = vmul.f32 %v366_v37, %v1852_v3  ;;  %v214_v37 = vrot.slane %v1933_v58, %v1896_v32 }
  0x41   :  { %v124_v57 = vadd.f32 %v123_v52, %v93_v45  ;;  %v186_v45 = vrot.slane %v1889_v28, %v1896_v32  ;;  %v1983_v52 = vsub.s32 3, %v1883_v24 }
  0x43   :  { %v125_v63 = vadd.f32 %v124_v57, %v94_v51  ;;  %v1992_v57 = vld [vmem:[#allocation2 + $0xd8] sm:$0xff] }
  0x44   :  { %v107_v23 = vmul.f32 %v1992_v57, %v1992_v57 }
  0x45   :  { %v126_v10 = vadd.f32 %v125_v63, %v95_v56  ;;  %v1990_v56 = vld [vmem:[#allocation2 + $0xd0] sm:$0xff]  ;;  %v103_v63 = vmul.f32 %v1970_v42, %v1970_v42 }
  0x47   :  { %v127_v20 = vadd.f32 %v126_v10, %v96_v62  ;;  %v309_v62 = vadd.f32 %v308_v48, %v278_v36  ;;  %v281_v10 = vmul.f32 %v186_v45, %v1889_v28  ;;  %v202_v45 = vrot.slane %v1912_v43, %v1896_v32  ;;  %v2032_v48 = vld [vmem:[#allocation2 + $0xf8] sm:$0xff] }
  0x48   :  { %2942 = vst [vmem:[#allocation21_spill] sm:$0xff] %v2032_v48 }
  0x49   :  { %v128_v30 = vadd.f32 %v127_v20, %v97_v9  ;;  %v2005_v9 = vld [vmem:[#allocation2 + $0xe0] sm:$0xff]  ;;  %v310_v13 = vadd.f32 %v309_v62, %v279_v46  ;;  %v106_v20 = vmul.f32 %v1990_v56, %v1990_v56  ;;  %v283_v46 = vmul.f32 %v194_v7, %v1900_v35 }
  0x4a   :  { %v109_v62 = vmul.f32 %v2018_v27, %v2018_v27  ;;  %v206_v7 = vrot.slane %v1918_v47, %v1896_v32 }
  0x4b   :  { %v129_v41 = vadd.f32 %v128_v30, %v98_v19  ;;  %v105_v19 = vmul.f32 %v1988_v55, %v1988_v55  ;;  %v198_v30 = vrot.slane %v1904_v38, %v1896_v32  ;;  %v311_v36 = vadd.f32 %v310_v13, %v280_v61 }
  0x4c   :  { %v484_v61 = vmul.f32 %v362_v16, %v1850_v2  ;;  %v2052_v16 = vmul.f32 %v2032_v48, %v2032_v48 }
  0x4d   :  { %v130_v51 = vadd.f32 %v129_v41, %v99_v29  ;;  %v2020_v29 = vld [vmem:[#allocation2 + $0xf0] sm:$0xff] }
  0x4f   :  { %v131_v6 = vadd.f32 %v130_v51, %v100_v40  ;;  %v108_v40 = vmul.f32 %v2005_v9, %v2005_v9  ;;  %v370_v51 = vrot.slane %v1854_v4, %v1978_v49 }
  0x51   :  { %v132_v26 = vadd.f32 %v131_v6, %v101_v50  ;;  %v312_v50 = vadd.f32 %v311_v36, %v281_v10  ;;  %v284_v10 = vmul.f32 %v198_v30, %v1904_v38  ;;  %v378_v30 = vrot.slane %v1866_v11, %v1978_v49 }
  0x53   :  { %v133_v41 = vadd.f32 %v132_v26, %v102_v59  ;;  %v2042_v59 = vmul.f32 %v2020_v29, %v2020_v29  ;;  %v313_v13 = vadd.f32 %v312_v50, %v282_v34  ;;  %v374_v26 = vrot.slane %v1862_v8, %v1978_v49 }
  0x54   :  { %v486_v34 = vmul.f32 %v370_v51, %v1854_v4  ;;  %v515_v50 = vadd.f32 %v484_v61, %v483_v60  ;;  %v222_v51 = vrot.slane %v1947_v12, %v1896_v32  ;;  %v287_v60 = vmul.f32 %v210_v17, %v1926_v53 }
  0x55   :  { %v134_v6 = vadd.f32 %v133_v41, %v103_v63  ;;  %v285_v63 = vmul.f32 %v202_v45, %v1912_v43  ;;  %v314_v41 = vadd.f32 %v313_v13, %v283_v46  ;;  %v382_v45 = vrot.slane %v1870_v14, %v1978_v49 }
  0x56   :  { %v487_v46 = vmul.f32 %v374_v26, %v1862_v8  ;;  %v516_v13 = vadd.f32 %v515_v50, %v485_v15  ;;  %v230_v26 = vrot.slane %v1961_v33, %v1896_v32  ;;  %v390_v17 = vrot.slane %v1878_v21, %v1978_v49 }
  0x57   :  { %v135_v36 = vadd.f32 %v134_v6, %v104_v5  ;;  %v286_v5 = vmul.f32 %v206_v7, %v1918_v47  ;;  %v315_v6 = vadd.f32 %v314_v41, %v284_v10  ;;  %v386_v7 = vrot.slane %v1874_v18, %v1978_v49 }
  0x58   :  { %v488_v10 = vmul.f32 %v378_v30, %v1866_v11  ;;  %v238_v30 = vrot.slane %v1970_v42, %v1896_v32 }
  0x59   :  { %v136_v24 = vadd.f32 %v135_v36, %v105_v19  ;;  %v226_v19 = vrot.slane %v1954_v22, %v1896_v32  ;;  %v316_v61 = vadd.f32 %v315_v6, %v285_v63  ;;  %v517_v36 = vadd.f32 %v516_v13, %v486_v34 }
  0x5a   :  { %v489_v63 = vmul.f32 %v382_v45, %v1870_v14  ;;  %v246_v45 = vrot.slane %v1988_v55, %v1896_v32 }
  0x5b   :  { %v137_v3 = vadd.f32 %v136_v24, %v106_v20  ;;  %v234_v24 = vrot.slane %v1966_v39, %v1896_v32  ;;  %v288_v20 = vmul.f32 %v214_v37, %v1933_v58  ;;  %v317_v15 = vadd.f32 %v316_v61, %v286_v5 }
  0x5c   :  { %v518_v50 = vadd.f32 %v517_v36, %v487_v46  ;;  %v394_v37 = vrot.slane %v1885_v25, %v1978_v49  ;;  %v490_v5 = vmul.f32 %v386_v7, %v1874_v18  ;;  %v290_v46 = vmul.f32 %v222_v51, %v1947_v12 }
  0x5d   :  { %v138_v41 = vadd.f32 %v137_v3, %v107_v23  ;;  %v242_v3 = vrot.slane %v1972_v44, %v1896_v32  ;;  %v289_v23 = vmul.f32 %v218_v54, %v1940_v0  ;;  %v318_v34 = vadd.f32 %v317_v15, %v287_v60 }
  0x5e   :  { %v519_v13 = vadd.f32 %v518_v50, %v488_v10  ;;  %v398_v54 = vrot.slane %v1889_v28, %v1978_v49  ;;  %v491_v60 = vmul.f32 %v390_v17, %v1878_v21  ;;  %v254_v7 = vrot.slane %v1992_v57, %v1896_v32 }
  0x5f   :  { %v139_v6 = vadd.f32 %v138_v41, %v108_v40  ;;  %v250_v40 = vrot.slane %v1990_v56, %v1896_v32  ;;  %v319_v36 = vadd.f32 %v318_v34, %v288_v20  ;;  %v262_v10 = vrot.slane %v2018_v27, %v1896_v32 }
  0x60   :  { %v520_v41 = vadd.f32 %v519_v13, %v489_v63  ;;  %v291_v15 = vmul.f32 %v226_v19, %v1954_v22  ;;  %v402_v51 = vrot.slane %v1893_v31, %v1978_v49  ;;  %v492_v20 = vmul.f32 %v394_v37, %v1885_v25 }
  0x61   :  { %v140_v61 = vadd.f32 %v139_v6, %v109_v62  ;;  %v258_v62 = vrot.slane %v2005_v9, %v1896_v32  ;;  %v320_v50 = vadd.f32 %v319_v36, %v289_v23  ;;  %v266_v63 = vrot.slane %v2020_v29, %v1896_v32 }
  0x62   :  { %v521_v6 = vadd.f32 %v520_v41, %v490_v5  ;;  %v270_v34 = vrot.slane %v2032_v48, %v1896_v32  ;;  %v292_v13 = vmul.f32 %v230_v26, %v1961_v33  ;;  %v406_v19 = vrot.slane %v1900_v35, %v1978_v49  ;;  %v2123_v41 = vld [vmem:[#allocation5] sm:$0xff] }
  0x63   :  { %v141_v17 = vadd.f32 %v140_v61, %v2042_v59  ;;  %v321_v21 = vadd.f32 %v320_v50, %v290_v46  ;;  %v493_v23 = vmul.f32 %v398_v54, %v1889_v28  ;;  %v293_v37 = vmul.f32 %v234_v24, %v1966_v39  ;;  %2943 = vst [vmem:[#allocation22_spill] sm:$0xff] %v2123_v41 }
  0x64   :  { %v522_v36 = vadd.f32 %v521_v6, %v491_v60  ;;  %v294_v5 = vmul.f32 %v238_v30, %v1970_v42  ;;  %v295_v59 = vmul.f32 %v242_v3, %v1972_v44  ;;  %v296_v61 = vmul.f32 %v246_v45, %v1988_v55 }
  0x65   :  { %v322_v25 = vadd.f32 %v321_v21, %v291_v15  ;;  %v410_v26 = vrot.slane %v1904_v38, %v1978_v49  ;;  %v494_v46 = vmul.f32 %v402_v51, %v1893_v31  ;;  %v2129_v54 = vadd.f32 %v141_v17, %v2052_v16 }
  0x66   :  { %v523_v50 = vadd.f32 %v522_v36, %v492_v20  ;;  %v297_v24 = vmul.f32 %v250_v40, %v1990_v56  ;;  %v2133_v30 = vmul.f32 %v254_v7, %v1992_v57  ;;  %v2136_v3 = vmul.f32 %v258_v62, %v2005_v9 }
  0x67   :  { %2944 = vst [vmem:[#allocation23_spill] sm:$0xff] %v2129_v54  ;;  %v323_v45 = vadd.f32 %v322_v25, %v292_v13  ;;  %v414_v21 = vrot.slane %v1912_v43, %v1978_v49  ;;  %v495_v60 = vmul.f32 %v406_v19, %v1900_v35  ;;  %v2142_v51 = vmul.f32 %v262_v10, %v2018_v27  ;;  %v2946_v19 = vld [vmem:[#allocation11_spill] sm:$0xff] }
  0x68   :  { %v524_v15 = vadd.f32 %v523_v50, %v493_v23  ;;  %v347_v16 = vrot.slane %v2123_v41, %v1896_v32  ;;  %v570_v40 = vrot.slane %v1848_v1, %v1983_v52  ;;  %v574_v7 = vrot.slane %v1850_v2, %v1983_v52 }
  0x69   :  { %v324_v62 = vadd.f32 %v323_v45, %v293_v37  ;;  %v418_v25 = vrot.slane %v1918_v47, %v1978_v49  ;;  %v496_v20 = vmul.f32 %v410_v26, %v1904_v38  ;;  %v2154_v17 = vmul.f32 %v266_v63, %v2020_v29 }
  0x6a   :  { %v525_v6 = vadd.f32 %v524_v15, %v494_v46  ;;  %v2157_v10 = vmul.f32 %v270_v34, %v2032_v48  ;;  %v337_v13 = vrot.slane %v2129_v54, %v1896_v32  ;;  %v578_v23 = vrot.slane %v2946_v19, %v1983_v52 }
  0x6b   :  { %v325_v36 = vadd.f32 %v324_v62, %v294_v5  ;;  %v422_v37 = vrot.slane %v1926_v53, %v1978_v49  ;;  %v497_v50 = vmul.f32 %v414_v21, %v1912_v43  ;;  %v2167_v46 = vmul.f32 %v347_v16, %v2123_v41 }
  0x6c   :  { %2945 = vst [vmem:[#allocation24_spill] sm:$0xff] %v2157_v10  ;;  %v526_v26 = vadd.f32 %v525_v6, %v495_v60  ;;  %v582_v63 = vrot.slane %v1854_v4, %v1983_v52  ;;  %v695_v34 = vmul.f32 %v570_v40, %v1848_v1  ;;  %v696_v32 = vmul.f32 %v574_v7, %v1850_v2 }
  0x6d   :  { %2947 = vst [vmem:[#allocation25_spill] sm:$0xff] %v2167_v46  ;;  %v326_v45 = vadd.f32 %v325_v36, %v295_v59  ;;  %v426_v5 = vrot.slane %v1933_v58, %v1978_v49  ;;  %v498_v15 = vmul.f32 %v418_v25, %v1918_v47  ;;  %v2177_v21 = vmul.f32 %v337_v13, %v2129_v54 }
  0x6e   :  { %v527_v62 = vadd.f32 %v526_v26, %v496_v20  ;;  %v430_v60 = vrot.slane %v1940_v0, %v1978_v49  ;;  %v586_v16 = vrot.slane %v1862_v8, %v1983_v52  ;;  %v697_v40 = vmul.f32 %v578_v23, %v2946_v19 }
  0x6f   :  { %v327_v6 = vadd.f32 %v326_v45, %v296_v61  ;;  %v434_v59 = vrot.slane %v1947_v12, %v1978_v49  ;;  %v499_v7 = vmul.f32 %v422_v37, %v1926_v53  ;;  %v549_v25 = vrot.slane %v2129_v54, %v1978_v49 }
  0x70   :  { %v528_v36 = vadd.f32 %v527_v62, %v497_v50  ;;  %v590_v20 = vrot.slane %v1866_v11, %v1983_v52  ;;  %v698_v13 = vmul.f32 %v582_v63, %v1854_v4  ;;  %v727_v26 = vadd.f32 %v696_v32, %v695_v34 }
  0x71   :  { %v438_v46 = vrot.slane %v1954_v22, %v1978_v49  ;;  %v442_v61 = vrot.slane %v1961_v33, %v1978_v49  ;;  %v500_v23 = vmul.f32 %v426_v5, %v1933_v58  ;;  %v2910_v37 = vmax.f32 %v2177_v21, 1e-16 }
  0x72   :  { %v529_v45 = vadd.f32 %v528_v36, %v498_v15  ;;  %v594_v50 = vrot.slane %v1870_v14, %v1983_v52  ;;  %v699_v62 = vmul.f32 %v586_v16, %v1862_v8  ;;  %v728_v19 = vadd.f32 %v727_v26, %v697_v40 }
  0x73   :  { %v328_v10 = vadd.f32 %v327_v6, %v297_v24  ;;  %v446_v63 = vrot.slane %v1966_v39, %v1978_v49  ;;  %v501_v34 = vmul.f32 %v430_v60, %v1940_v0  ;;  %v2205_v4 = vmul.f32 %v549_v25, %v2129_v54  ;;  %v2948_v60 = vld [vmem:[#allocation15_spill] sm:$0xff] }
  0x74   :  { %v530_v32 = vadd.f32 %v529_v45, %v499_v7  ;;  %v598_v5 = vrot.slane %v1874_v18, %v1983_v52  ;;  %v700_v15 = vmul.f32 %v590_v20, %v1866_v11  ;;  %v729_v36 = vadd.f32 %v728_v19, %v698_v13 }
  0x75   :  { %v450_v16 = vrot.slane %v1970_v42, %v1978_v49  ;;  %v454_v24 = vrot.slane %v1972_v44, %v1978_v49  ;;  %v502_v40 = vmul.f32 %v434_v59, %v1947_v12  ;;  %1682 = vrcp.f32 %v2910_v37 }
  0x76   :  { %v531_v6 = vadd.f32 %v530_v32, %v500_v23  ;;  %v602_v7 = vrot.slane %v2948_v60, %v1983_v52  ;;  %v701_v25 = vmul.f32 %v594_v50, %v1870_v14  ;;  %v730_v26 = vadd.f32 %v729_v36, %v699_v62  ;;  %v2949_v23 = vld [vmem:[#allocation17_spill] sm:$0xff] }
  0x77   :  { %v329_v19 = vadd.f32 %v328_v10, %v2133_v30  ;;  %v458_v20 = vrot.slane %v1988_v55, %v1978_v49  ;;  %v503_v13 = vmul.f32 %v438_v46, %v1954_v22  ;;  %v606_v32 = vrot.slane %v2949_v23, %v1983_v52 }
  0x78   :  { %v532_v45 = vadd.f32 %v531_v6, %v501_v34  ;;  %v702_v37 = vmul.f32 %v598_v5, %v1874_v18  ;;  %v731_v11 = vadd.f32 %v730_v26, %v700_v15  ;;  %v462_v50 = vrot.slane %v1990_v56, %v1978_v49 }
  0x79   :  { %v466_v30 = vrot.slane %v1992_v57, %v1978_v49  ;;  %v504_v10 = vmul.f32 %v442_v61, %v1961_v33  ;;  %v470_v46 = vrot.slane %v2005_v9, %v1978_v49  ;;  %v610_v34 = vrot.slane %v1889_v28, %v1983_v52 }
  0x7a   :  { %v533_v62 = vadd.f32 %v532_v45, %v502_v40  ;;  %v703_v36 = vmul.f32 %v602_v7, %v2948_v60  ;;  %v732_v6 = vadd.f32 %v731_v11, %v701_v25  ;;  %v330_v5 = vadd.f32 %v329_v19, %v2136_v3 }
  0x7b   :  { %v474_v15 = vrot.slane %v2018_v27, %v1978_v49  ;;  %v505_v26 = vmul.f32 %v446_v63, %v1966_v39  ;;  %v2950_v61 = vmax.f32 %v2205_v4, 1e-16  ;;  %v614_v40 = vrot.slane %v1893_v31, %v1983_v52 }
  0x7c   :  { %v534_v59 = vadd.f32 %v533_v62, %v503_v13  ;;  %v704_v45 = vmul.f32 %v606_v32, %v2949_v23  ;;  %v733_v18 = vadd.f32 %v732_v6, %v702_v37  ;;  %v478_v11 = vrot.slane %v2020_v29, %v1978_v49 }
  0x7d   :  { %1684 = vrcp.f32 %v2950_v61  ;;  %v482_v3 = vrot.slane %v2032_v48, %v1978_v49  ;;  %v506_v7 = vmul.f32 %v450_v16, %v1970_v42  ;;  %v507_v63 = vmul.f32 %v454_v24, %v1972_v44 }
  0x7e   :  { %v535_v25 = vadd.f32 %v534_v59, %v504_v10  ;;  %v618_v19 = vrot.slane %v1900_v35, %v1983_v52  ;;  %v705_v13 = vmul.f32 %v610_v34, %v1889_v28  ;;  %v734_v62 = vadd.f32 %v733_v18, %v703_v36 }
  0x7f   :  { %v331_v32 = vadd.f32 %v330_v5, %v2142_v51  ;;  %v508_v37 = vmul.f32 %v458_v20, %v1988_v55  ;;  %v509_v6 = vmul.f32 %v462_v50, %v1990_v56  ;;  %v1683_v23 = vpop.eup %1682  ;;  %v559_v16 = vrot.slane %v2123_v41, %v1978_v49 }
  0x80   :  { %v536_v61 = vadd.f32 %v535_v25, %v505_v26  ;;  %v622_v24 = vrot.slane %v1904_v38, %v1983_v52  ;;  %v706_v59 = vmul.f32 %v614_v40, %v1893_v31  ;;  %v735_v10 = vadd.f32 %v734_v62, %v704_v45 }
  0x81   :  { %v510_v34 = vmul.f32 %v466_v30, %v1992_v57  ;;  %v511_v18 = vmul.f32 %v470_v46, %v2005_v9  ;;  %v512_v51 = vmul.f32 %v474_v15, %v2018_v27  ;;  %v513_v50 = vmul.f32 %v478_v11, %v2020_v29 }
  0x82   :  { %v537_v20 = vadd.f32 %v536_v61, %v506_v7  ;;  %v626_v36 = vrot.slane %v1912_v43, %v1983_v52  ;;  %v707_v49 = vmul.f32 %v618_v19, %v1900_v35  ;;  %v736_v5 = vadd.f32 %v735_v10, %v705_v13 }
  0x83   :  { %v332_v26 = vadd.f32 %v331_v32, %v2154_v17  ;;  %v2951_v40 = vmax.f32 %v2177_v21, 1e-16  ;;  %v514_v30 = vmul.f32 %v482_v3, %v2032_v48  ;;  %v2276_v46 = vmul.f32 %v559_v16, %v2123_v41  ;;  %v2952_v32 = vld [vmem:[#allocation20_spill] sm:$0xff] }
  0x84   :  { %v538_v25 = vadd.f32 %v537_v20, %v507_v63  ;;  %v630_v15 = vrot.slane %v1918_v47, %v1983_v52  ;;  %v708_v11 = vmul.f32 %v622_v24, %v1904_v38  ;;  %v737_v7 = vadd.f32 %v736_v5, %v706_v59 }
  0x85   :  { %v341_v45 = vmul.f32 %v1683_v23, %v2951_v40  ;;  %v634_v19 = vrot.slane %v1926_v53, %v1983_v52  ;;  %v638_v17 = vrot.slane %v1933_v58, %v1983_v52  ;;  %v642_v21 = vrot.slane %v1940_v0, %v1983_v52 }
  0x86   :  { %v539_v62 = vadd.f32 %v538_v25, %v508_v37  ;;  %v709_v63 = vmul.f32 %v626_v36, %v1912_v43  ;;  %v738_v13 = vadd.f32 %v737_v7, %v707_v49  ;;  %v782_v61 = vrot.slane %v1848_v1, %v2952_v32  ;;  %v2953_v37 = vld [vmem:[#allocation24_spill] sm:$0xff]  ;;  %v2954_v49 = vld [vmem:[#allocation11_spill] sm:$0xff] }
  0x87   :  { %v1685_v3 = vpop.eup %1684  ;;  %v786_v16 = vrot.slane %v1850_v2, %v2952_v32  ;;  %v333_v24 = vadd.f32 %v332_v26, %v2953_v37  ;;  %v342_v59 = vsub.f32 2.0, %v341_v45  ;;  %v646_v20 = vrot.slane %v1947_v12, %v1983_v52 }
  0x88   :  { %v540_v10 = vadd.f32 %v539_v62, %v509_v6  ;;  %v650_v5 = vrot.slane %v1954_v22, %v1983_v52  ;;  %v710_v40 = vmul.f32 %v630_v15, %v1918_v47  ;;  %v739_v36 = vadd.f32 %v738_v13, %v708_v11  ;;  %v2956_v62 = vld [vmem:[#allocation12_spill] sm:$0xff] }
  0x89   :  { %v790_v25 = vrot.slane %v2954_v49, %v2952_v32  ;;  %v2955_v41 = vmax.f32 %v2205_v4, 1e-16  ;;  %v711_v26 = vmul.f32 %v634_v19, %v1926_v53  ;;  %v761_v6 = vrot.slane %v2129_v54, %v1983_v52 }
  0x8a   :  { %v541_v7 = vadd.f32 %v540_v10, %v510_v34  ;;  %v740_v45 = vadd.f32 %v739_v36, %v709_v63  ;;  %v794_v37 = vrot.slane %v2956_v62, %v2952_v32  ;;  %v907_v48 = vmul.f32 %v782_v61, %v1848_v1 }
  0x8b   :  { %v553_v43 = vmul.f32 %v1685_v3, %v2955_v41  ;;  %v908_v15 = vmul.f32 %v786_v16, %v1850_v2  ;;  %v343_v11 = vmul.f32 %v1683_v23, %v342_v59  ;;  %v349_v13 = vmul.f32 %v333_v24, %v333_v24  ;;  %v2957_v41 = vld [vmem:[#allocation16_spill] sm:$0xff]  ;;  %v2958_v24 = vld [vmem:[#allocation13_spill] sm:$0xff] }
  0x8c   :  { %v542_v47 = vadd.f32 %v541_v7, %v511_v18  ;;  %v654_v4 = vrot.slane %v1961_v33, %v1983_v52  ;;  %vm352_vm0 = vcmp.lt.s32.totalorder %v2957_v41, 1  ;;  %v712_v34 = vmul.f32 %v638_v17, %v1933_v58 }
  0x8d   :  { %v741_v19 = vadd.f32 %v740_v45, %v710_v40  ;;  %v798_v63 = vrot.slane %v1862_v8, %v2952_v32  ;;  %v909_v10 = vmul.f32 %v790_v25, %v2954_v49  ;;  %v554_v61 = vsub.f32 2.0, %v553_v43 }
  0x8e   :  { %v543_v36 = vadd.f32 %v542_v47, %v512_v51  ;;  %v713_v16 = vmul.f32 %v642_v21, %v1940_v0  ;;  %v2318_v23 = vmul.f32 %v761_v6, %v2129_v54  ;;  %vm564_vm1 = vcmp.lt.s32.totalorder %v2957_v41, 2 }
  0x8f   :  { %v742_v18 = vadd.f32 %v741_v19, %v711_v26  ;;  %v802_v59 = vrot.slane %v2958_v24, %v2952_v32  ;;  %v910_v17 = vmul.f32 %v794_v37, %v2956_v62  ;;  %v939_v40 = vadd.f32 %v908_v15, %v907_v48 }
  0x90   :  { %v350_v7 = vmul.f32 %v349_v13, %v343_v11  ;;  %v544_v45 = vadd.f32 %v543_v36, %v513_v50  ;;  %v658_v47 = vrot.slane %v1966_v39, %v1983_v52  ;;  %v714_v43 = vmul.f32 %v646_v20, %v1947_v12  ;;  %v2959_v50 = vld [vmem:[#allocation14_spill] sm:$0xff]  ;;  %v2960_v13 = vld [vmem:[#allocation25_spill] sm:$0xff] }
  0x91   :  { %v743_v51 = vadd.f32 %v742_v18, %v712_v34  ;;  %v806_v21 = vrot.slane %v1870_v14, %v2952_v32  ;;  %v911_v25 = vmul.f32 %v798_v63, %v1862_v8  ;;  %v940_v26 = vadd.f32 %v939_v40, %v909_v10  ;;  %v2961_v40 = vld [vmem:[#allocation17_spill] sm:$0xff] }
  0x92   :  { %v545_v6 = vadd.f32 %v544_v45, %v514_v30  ;;  %v555_v19 = vmul.f32 %v1685_v3, %v554_v61  ;;  %v715_v54 = vmul.f32 %v650_v5, %v1954_v22  ;;  %v763_v48 = vmax.f32 %v2318_v23, 1e-16 }
  0x93   :  { %v744_v37 = vadd.f32 %v743_v51, %v713_v16  ;;  %v810_v15 = vrot.slane %v2959_v50, %v2952_v32  ;;  %v912_v11 = vmul.f32 %v802_v59, %v2958_v24  ;;  %v941_v20 = vadd.f32 %v940_v26, %v910_v17 }
  0x94   :  { %v351_v34 = vmul.f32 %v350_v7, %v2960_v13  ;;  %v561_v36 = vmul.f32 %v545_v6, %v545_v6  ;;  %v662_v63 = vrot.slane %v1970_v42, %v1983_v52  ;;  %v716_v30 = vmul.f32 %v654_v4, %v1961_v33 }
  0x95   :  { %v745_v3 = vadd.f32 %v744_v37, %v714_v43  ;;  %v814_v5 = vrot.slane %v2948_v60, %v2952_v32  ;;  %v913_v10 = vmul.f32 %v806_v21, %v1870_v14  ;;  %v942_v61 = vadd.f32 %v941_v20, %v911_v25 }
  0x96   :  { %v562_v16 = vmul.f32 %v561_v36, %v555_v19  ;;  %v666_v18 = vrot.slane %v1972_v44, %v1983_v52  ;;  %v717_v59 = vmul.f32 %v658_v47, %v1966_v39  ;;  %1686 = vrcp.f32 %v763_v48 }
  0x97   :  { %v746_v17 = vadd.f32 %v745_v3, %v715_v54  ;;  %v818_v4 = vrot.slane %v2961_v40, %v2952_v32  ;;  %v914_v7 = vmul.f32 %v810_v15, %v2959_v50  ;;  %v943_v45 = vadd.f32 %v942_v61, %v912_v11 }
  0x98   :  { %v353_v43 = vsel %vm352_vm0, %v351_v34, 0.0  ;;  %v563_v51 = vmul.f32 %v562_v16, %v2276_v46  ;;  %v670_v21 = vrot.slane %v1988_v55, %v1983_v52  ;;  %v718_v47 = vmul.f32 %v662_v63, %v1970_v42 }
  0x99   :  { %v747_v25 = vadd.f32 %v746_v17, %v716_v30  ;;  %v822_v54 = vrot.slane %v1889_v28, %v2952_v32  ;;  %v915_v26 = vmul.f32 %v814_v5, %v2948_v60  ;;  %v944_v6 = vadd.f32 %v943_v45, %v913_v10 }
  0x9a   :  { %v565_v19 = vsel %vm564_vm1, %v563_v51, 0.0  ;;  %v674_v37 = vrot.slane %v1990_v56, %v1983_v52  ;;  %v719_v46 = vmul.f32 %v666_v18, %v1972_v44  ;;  %v826_v15 = vrot.slane %v1893_v31, %v2952_v32 }
  0x9b   :  { %v2366_v11 = vadd.f32 %v565_v19, %v353_v43  ;;  %v748_v20 = vadd.f32 %v747_v25, %v717_v59  ;;  %v916_v13 = vmul.f32 %v818_v4, %v2961_v40  ;;  %v945_v34 = vadd.f32 %v944_v6, %v914_v7 }
  0x9c   :  { %v678_v36 = vrot.slane %v1992_v57, %v1983_v52  ;;  %v720_v63 = vmul.f32 %v670_v21, %v1988_v55  ;;  %v830_v3 = vrot.slane %v1900_v35, %v2952_v32  ;;  %v917_v5 = vmul.f32 %v822_v54, %v1889_v28  ;;  %v2962_v21 = vld [vmem:[#allocation21_spill] sm:$0xff] }
  0x9d   :  { %v749_v30 = vadd.f32 %v748_v20, %v718_v47  ;;  %v946_v10 = vadd.f32 %v945_v34, %v915_v26  ;;  %v682_v61 = vrot.slane %v2005_v9, %v1983_v52  ;;  %v686_v16 = vrot.slane %v2018_v27, %v1983_v52  ;;  %v2963_v26 = vld [vmem:[#allocation18_spill] sm:$0xff] }
  0x9e   :  { %v721_v18 = vmul.f32 %v674_v37, %v1990_v56  ;;  %v2381_v59 = vsub.s32 5, %v2957_v41  ;;  %v834_v4 = vrot.slane %v1904_v38, %v2952_v32  ;;  %v918_v7 = vmul.f32 %v826_v15, %v1893_v31 }
  0x9f   :  { %v750_v17 = vadd.f32 %v749_v30, %v719_v46  ;;  %v947_v45 = vadd.f32 %v946_v10, %v916_v13  ;;  %v690_v51 = vrot.slane %v2020_v29, %v1983_v52  ;;  %v694_v47 = vrot.slane %v2962_v21, %v1983_v52 }
  0xa0   :  { %v1687_v43 = vpop.eup %1686  ;;  %v722_v25 = vmul.f32 %v678_v36, %v1992_v57  ;;  %v838_v6 = vrot.slane %v2963_v26, %v2952_v32  ;;  %v919_v19 = vmul.f32 %v830_v3, %v1900_v35  ;;  %v723_v46 = vmul.f32 %v682_v61, %v2005_v9  ;;  %v2964_v36 = vld [vmem:[#allocation19_spill] sm:$0xff] }
  0xa1   :  { %v751_v54 = vadd.f32 %v750_v17, %v720_v63  ;;  %v948_v37 = vadd.f32 %v947_v45, %v917_v5  ;;  %v724_v15 = vmul.f32 %v686_v16, %v2018_v27  ;;  %v994_v20 = vrot.slane %v1848_v1, %v2381_v59 }
  0xa2   :  { %v998_v13 = vrot.slane %v1850_v2, %v2381_v59  ;;  %v842_v63 = vrot.slane %v2964_v36, %v2952_v32  ;;  %v920_v30 = vmul.f32 %v834_v4, %v1904_v38  ;;  %v725_v3 = vmul.f32 %v690_v51, %v2020_v29  ;;  %v2965_v4 = vld [vmem:[#allocation22_spill] sm:$0xff] }
  0xa3   :  { %v752_v34 = vadd.f32 %v751_v54, %v721_v18  ;;  %v949_v10 = vadd.f32 %v948_v37, %v918_v7  ;;  %v726_v5 = vmul.f32 %v694_v47, %v2962_v21  ;;  %v765_v61 = vmul.f32 %v1687_v43, %v763_v48 }
  0xa4   :  { %v1002_v16 = vrot.slane %v2954_v49, %v2381_v59  ;;  %v846_v18 = vrot.slane %v1926_v53, %v2952_v32  ;;  %v921_v45 = vmul.f32 %v838_v6, %v2963_v26  ;;  %v771_v7 = vrot.slane %v2965_v4, %v1983_v52 }
  0xa5   :  { %v753_v17 = vadd.f32 %v752_v34, %v722_v25  ;;  %v950_v54 = vadd.f32 %v949_v10, %v919_v19  ;;  %v1006_v51 = vrot.slane %v2956_v62, %v2381_v59  ;;  %v1119_v47 = vmul.f32 %v994_v20, %v1848_v1 }
  0xa6   :  { %v1120_v23 = vmul.f32 %v998_v13, %v1850_v2  ;;  %v850_v25 = vrot.slane %v1933_v58, %v2952_v32  ;;  %v922_v37 = vmul.f32 %v842_v63, %v2964_v36  ;;  %v766_v21 = vsub.f32 2.0, %v765_v61 }
  0xa7   :  { %v754_v48 = vadd.f32 %v753_v17, %v723_v46  ;;  %v951_v34 = vadd.f32 %v950_v54, %v920_v30  ;;  %v854_v26 = vrot.slane %v1940_v0, %v2952_v32  ;;  %v1010_v52 = vrot.slane %v1862_v8, %v2381_v59  ;;  %v2966_v46 = vld [vmem:[#allocation23_spill] sm:$0xff] }
  0xa8   :  { %v1121_v6 = vmul.f32 %v1002_v16, %v2954_v49  ;;  %v923_v1 = vmul.f32 %v846_v18, %v1926_v53  ;;  %v973_v20 = vrot.slane %v2966_v46, %v2952_v32  ;;  %v858_v13 = vrot.slane %v1947_v12, %v2952_v32 }
  0xa9   :  { %v755_v19 = vadd.f32 %v754_v48, %v724_v15  ;;  %v952_v2 = vadd.f32 %v951_v34, %v921_v45  ;;  %v1014_v36 = vrot.slane %v2958_v24, %v2381_v59  ;;  %v1122_v63 = vmul.f32 %v1006_v51, %v2956_v62 }
  0xaa   :  { %v1151_v30 = vadd.f32 %v1120_v23, %v1119_v47  ;;  %v862_v49 = vrot.slane %v1954_v22, %v2952_v32  ;;  %v924_v15 = vmul.f32 %v850_v25, %v1933_v58  ;;  %v767_v61 = vmul.f32 %v1687_v43, %v766_v21 }
  0xab   :  { %v756_v10 = vadd.f32 %v755_v19, %v725_v3  ;;  %v953_v53 = vadd.f32 %v952_v2, %v922_v37  ;;  %v1018_v16 = vrot.slane %v1870_v14, %v2381_v59  ;;  %v1123_v17 = vmul.f32 %v1010_v52, %v1862_v8 }
  0xac   :  { %v1152_v18 = vadd.f32 %v1151_v30, %v1121_v6  ;;  %v925_v54 = vmul.f32 %v854_v26, %v1940_v0  ;;  %v2442_v62 = vmul.f32 %v973_v20, %v2966_v46  ;;  %v772_v3 = vmul.f32 %v771_v7, %v2965_v4 }
  0xad   :  { %v757_v45 = vadd.f32 %v756_v10, %v726_v5  ;;  %v954_v48 = vadd.f32 %v953_v53, %v923_v1  ;;  %v1022_v58 = vrot.slane %v2959_v50, %v2381_v59  ;;  %v1124_v43 = vmul.f32 %v1014_v36, %v2958_v24 }
  0xae   :  { %v1153_v21 = vadd.f32 %v1152_v18, %v1122_v63  ;;  %v866_v8 = vrot.slane %v1961_v33, %v2952_v32  ;;  %v926_v5 = vmul.f32 %v858_v13, %v1947_v12  ;;  %v870_v0 = vrot.slane %v1966_v39, %v2952_v32 }
  0xaf   :  { %v773_v51 = vmul.f32 %v757_v45, %v757_v45  ;;  %v955_v47 = vadd.f32 %v954_v48, %v924_v15  ;;  %v1026_v23 = vrot.slane %v2948_v60, %v2381_v59  ;;  %v1125_v7 = vmul.f32 %v1018_v16, %v1870_v14  ;;  %v2488_v16 = vld [vmem:[#allocation2 + $0x50] sm:$0xff]  ;;  %v2498_v48 = vld [vmem:[#allocation2 + $0x58] sm:$0xff] }
  0xb0   :  { %v1154_v25 = vadd.f32 %v1153_v21, %v1123_v17  ;;  %v927_v24 = vmul.f32 %v862_v49, %v1954_v22  ;;  %v975_v26 = vmax.f32 %v2442_v62, 1e-16  ;;  %vm776_vm2 = vcmp.lt.s32.totalorder %v2957_v41, 3  ;;  %v2967_v21 = vld [vmem:[#allocation21_spill] sm:$0xff] }
  0xb1   :  { %v774_v37 = vmul.f32 %v773_v51, %v767_v61  ;;  %v956_v34 = vadd.f32 %v955_v47, %v925_v54  ;;  %v1030_v12 = vrot.slane %v2961_v40, %v2381_v59  ;;  %v1126_v52 = vmul.f32 %v1022_v58, %v2959_v50 }
  0xb2   :  { %v1155_v6 = vadd.f32 %v1154_v25, %v1124_v43  ;;  %v874_v1 = vrot.slane %v1970_v42, %v2952_v32  ;;  %v928_v14 = vmul.f32 %v866_v8, %v1961_v33  ;;  %v878_v22 = vrot.slane %v1972_v44, %v2952_v32 }
  0xb3   :  { %v775_v19 = vmul.f32 %v774_v37, %v772_v3  ;;  %v957_v2 = vadd.f32 %v956_v34, %v926_v5  ;;  %v1034_v20 = vrot.slane %v1889_v28, %v2381_v59  ;;  %v1127_v13 = vmul.f32 %v1026_v23, %v2948_v60  ;;  %v2519_v34 = vld [vmem:[#allocation2 + $0x78] sm:$0xff] }
  0xb4   :  { %v1156_v36 = vadd.f32 %v1155_v6, %v1125_v7  ;;  %v929_v50 = vmul.f32 %v870_v0, %v1966_v39  ;;  %1688 = vrcp.f32 %v975_v26  ;;  %v1038_v33 = vrot.slane %v1893_v31, %v2381_v59  ;;  %v2514_v0 = vld [vmem:[#allocation2 + $0x60] sm:$0xff] }
  0xb5   :  { %v777_v63 = vsel %vm776_vm2, %v775_v19, 0.0  ;;  %v958_v30 = vadd.f32 %v957_v2, %v927_v24  ;;  %v1128_v49 = vmul.f32 %v1030_v12, %v2961_v40  ;;  %v882_v28 = vrot.slane %v1988_v55, %v2952_v32  ;;  %v2526_v6 = vld [vmem:[#allocation2] sm:$0xff] }
  0xb6   :  { %v2474_v10 = vadd.f32 %v777_v63, %v2366_v11  ;;  %v1157_v15 = vadd.f32 %v1156_v36, %v1126_v52  ;;  %v886_v60 = vrot.slane %v1990_v56, %v2952_v32  ;;  %v930_v39 = vmul.f32 %v874_v1, %v1970_v42  ;;  %v2530_v1 = vld [vmem:[#allocation2 + $0x8] sm:$0xff] }
  0xb7   :  { %v959_v53 = vadd.f32 %v958_v30, %v928_v14  ;;  %v890_v61 = vrot.slane %v1992_v57, %v2952_v32  ;;  %v1042_v11 = vrot.slane %v1900_v35, %v2381_v59  ;;  %v1129_v31 = vmul.f32 %v2488_v16, %v1034_v20  ;;  %v2543_v30 = vld [vmem:[#allocation2 + $0x10] sm:$0xff] }
  0xb8   :  { %v1158_v40 = vadd.f32 %v1157_v15, %v1127_v13  ;;  %v894_v17 = vrot.slane %v2005_v9, %v2952_v32  ;;  %v898_v18 = vrot.slane %v2018_v27, %v2952_v32  ;;  %v931_v42 = vmul.f32 %v878_v22, %v1972_v44  ;;  %v2538_v13 = vld [vmem:[#allocation2 + $0x80] sm:$0xff] }
  0xb9   :  { %v960_v45 = vadd.f32 %v959_v53, %v929_v50  ;;  %v1046_v54 = vrot.slane %v1904_v38, %v2381_v59  ;;  %v1130_v35 = vmul.f32 %v2498_v48, %v1038_v33  ;;  %v2502_v58 = vsub.s32 6, %v2957_v41  ;;  %v2510_v38 = vld [vmem:[#allocation2 + $0x70] sm:$0xff] }
  0xba   :  { %v1159_v3 = vadd.f32 %v1158_v40, %v1128_v49  ;;  %v902_v43 = vrot.slane %v2020_v29, %v2952_v32  ;;  %v906_v51 = vrot.slane %v2967_v21, %v2952_v32  ;;  %v932_v44 = vmul.f32 %v882_v28, %v1988_v55  ;;  %v2548_v49 = vld [vmem:[#allocation2 + $0x88] sm:$0xff] }
  0xbb   :  { %v961_v8 = vadd.f32 %v960_v45, %v930_v39  ;;  %v933_v5 = vmul.f32 %v886_v60, %v1990_v56  ;;  %v1050_v47 = vrot.slane %v2510_v38, %v2381_v59  ;;  %v1131_v23 = vmul.f32 %v2514_v0, %v1042_v11  ;;  %v2523_v56 = vld [vmem:[#allocation2 + $0x68] sm:$0xff]  ;;  %v2553_v60 = vld [vmem:[#allocation2 + $0x18] sm:$0xff] }
  0xbc   :  { %v1160_v7 = vadd.f32 %v1159_v3, %v1129_v31  ;;  %v934_v25 = vmul.f32 %v890_v61, %v1992_v57  ;;  %v935_v37 = vmul.f32 %v894_v17, %v2005_v9  ;;  %v1054_v55 = vrot.slane %v2519_v34, %v2381_v59  ;;  %v2564_v17 = vld [vmem:[#allocation2 + $0x90] sm:$0xff] }
  0xbd   :  { %v962_v24 = vadd.f32 %v961_v8, %v931_v42  ;;  %v1132_v12 = vmul.f32 %v2523_v56, %v1046_v54  ;;  %v1206_v19 = vrot.slane %v2526_v6, %v2502_v58  ;;  %v1210_v57 = vrot.slane %v2530_v1, %v2502_v58  ;;  %v2569_v54 = vld [vmem:[#allocation2 + $0x20] sm:$0xff]  ;;  %v2581_v8 = vld [vmem:[#allocation2 + $0x28] sm:$0xff] }
  0xbe   :  { %v1161_v52 = vadd.f32 %v1160_v7, %v1130_v35  ;;  %v1689_v9 = vpop.eup %1688  ;;  %v936_v14 = vmul.f32 %v898_v18, %v2018_v27  ;;  %v937_v2 = vmul.f32 %v902_v43, %v2020_v29  ;;  %v983_v20 = vrot.slane %v2965_v4, %v2952_v32 }
  0xbf   :  { %v963_v22 = vadd.f32 %v962_v24, %v932_v44  ;;  %v1058_v36 = vrot.slane %v2538_v13, %v2381_v59  ;;  %v1133_v63 = vmul.f32 %v2510_v38, %v1050_v47  ;;  %v1214_v33 = vrot.slane %v2543_v30, %v2502_v58 }
  0xc0   :  { %v1162_v50 = vadd.f32 %v1161_v52, %v1131_v23  ;;  %v938_v27 = vmul.f32 %v906_v51, %v2967_v21  ;;  %v1062_v32 = vrot.slane %v2548_v49, %v2381_v59  ;;  %v1134_v15 = vmul.f32 %v2519_v34, %v1054_v55  ;;  %v2591_v52 = vld [vmem:[#allocation2 + $0x30] sm:$0xff] }
  0xc1   :  { %v964_v29 = vadd.f32 %v963_v22, %v933_v5  ;;  %v1218_v39 = vrot.slane %v2553_v60, %v2502_v58  ;;  %v1331_v53 = vmul.f32 %v2526_v6, %v1206_v19  ;;  %v1332_v61 = vmul.f32 %v2530_v1, %v1210_v57 }
  0xc2   :  { %v1163_v28 = vadd.f32 %v1162_v50, %v1132_v12  ;;  %v977_v31 = vmul.f32 %v1689_v9, %v975_v26  ;;  %v2562_v40 = vmul.f32 %v983_v20, %v2965_v4  ;;  %v1066_v18 = vrot.slane %v2564_v17, %v2381_v59  ;;  %v2574_v26 = vld [vmem:[#allocation2 + $0x98] sm:$0xff] }
  0xc3   :  { %v965_v11 = vadd.f32 %v964_v29, %v934_v25  ;;  %v1135_v42 = vmul.f32 %v2538_v13, %v1058_v36  ;;  %v1222_v35 = vrot.slane %v2569_v54, %v2502_v58  ;;  %v1333_v3 = vmul.f32 %v2543_v30, %v1214_v33  ;;  %v2596_v36 = vld [vmem:[#allocation2 + $0xa8] sm:$0xff]  ;;  %v2604_v29 = vld [vmem:[#allocation2 + $0x38] sm:$0xff] }
  0xc4   :  { %v1164_v45 = vadd.f32 %v1163_v28, %v1133_v63  ;;  %v1070_v43 = vrot.slane %v2574_v26, %v2381_v59  ;;  %v1136_v21 = vmul.f32 %v2548_v49, %v1062_v32  ;;  %v1185_v51 = vrot.slane %v2966_v46, %v2381_v59 }
  0xc5   :  { %v966_v62 = vadd.f32 %v965_v11, %v935_v37  ;;  %v1226_v5 = vrot.slane %v2581_v8, %v2502_v58  ;;  %v1334_v47 = vmul.f32 %v2553_v60, %v1218_v39  ;;  %v1363_v23 = vadd.f32 %v1332_v61, %v1331_v53  ;;  %v2586_v37 = vld [vmem:[#allocation2 + $0xa0] sm:$0xff]  ;;  %v2609_v53 = vld [vmem:[#allocation2 + $0xb0] sm:$0xff] }
  0xc6   :  { %v1165_v44 = vadd.f32 %v1164_v45, %v1134_v15  ;;  %v978_v25 = vsub.f32 2.0, %v977_v31  ;;  %v1074_v24 = vrot.slane %v2586_v37, %v2381_v59  ;;  %v1137_v55 = vmul.f32 %v2564_v17, %v1066_v18  ;;  %v2614_v18 = vld [vmem:[#allocation2 + $0x40] sm:$0xff] }
  0xc7   :  { %v967_v7 = vadd.f32 %v966_v62, %v936_v14  ;;  %v1230_v19 = vrot.slane %v2591_v52, %v2502_v58  ;;  %v1335_v57 = vmul.f32 %v2569_v54, %v1222_v35  ;;  %v1364_v22 = vadd.f32 %v1363_v23, %v1333_v3  ;;  %v2619_v62 = vld [vmem:[#allocation2 + $0xb8] sm:$0xff] }
  0xc8   :  { %v1166_v12 = vadd.f32 %v1165_v44, %v1135_v42  ;;  %v1078_v14 = vrot.slane %v2596_v36, %v2381_v59  ;;  %v1138_v63 = vmul.f32 %v2574_v26, %v1070_v43  ;;  %v2602_v50 = vmul.f32 %v1185_v51, %v2966_v46  ;;  %v2625_v51 = vld [vmem:[#allocation2 + $0x48] sm:$0xff] }
  0xc9   :  { %v968_v20 = vadd.f32 %v967_v7, %v937_v2  ;;  %v1234_v32 = vrot.slane %v2604_v29, %v2502_v58  ;;  %v1336_v15 = vmul.f32 %v2581_v8, %v1226_v5  ;;  %v1365_v28 = vadd.f32 %v1364_v22, %v1334_v47  ;;  %v2631_v7 = vld [vmem:[#allocation2 + $0xc0] sm:$0xff] }
  0xca   :  { %v1167_v33 = vadd.f32 %v1166_v12, %v1136_v21  ;;  %v979_v39 = vmul.f32 %v1689_v9, %v978_v25  ;;  %v1082_v61 = vrot.slane %v2609_v53, %v2381_v59  ;;  %v1139_v11 = vmul.f32 %v2586_v37, %v1074_v24 }
  0xcb   :  { %v969_v2 = vadd.f32 %v968_v20, %v938_v27  ;;  %v1238_v42 = vrot.slane %v2614_v18, %v2502_v58  ;;  %v1337_v45 = vmul.f32 %v2591_v52, %v1230_v19  ;;  %v1366_v35 = vadd.f32 %v1365_v28, %v1335_v57  ;;  %v2640_v20 = vld [vmem:[#allocation2 + $0xc8] sm:$0xff] }
  0xcc   :  { %v1168_v31 = vadd.f32 %v1167_v33, %v1137_v55  ;;  %v1086_v9 = vrot.slane %v2619_v62, %v2381_v59  ;;  %v1140_v27 = vmul.f32 %v2596_v36, %v1078_v14  ;;  %v2927_v43 = vmax.f32 %v2602_v50, 1e-16 }
  0xcd   :  { %v985_v3 = vmul.f32 %v969_v2, %v969_v2  ;;  %v1242_v44 = vrot.slane %v2625_v51, %v2502_v58  ;;  %v1338_v5 = vmul.f32 %v2604_v29, %v1234_v32  ;;  %v1367_v47 = vadd.f32 %v1366_v35, %v1336_v15  ;;  %v2652_v2 = vld [vmem:[#allocation2 + $0xd0] sm:$0xff] }
  0xce   :  { %v1169_v21 = vadd.f32 %v1168_v31, %v1138_v63  ;;  %vm988_vm3 = vcmp.lt.s32.totalorder %v2957_v41, 4  ;;  %v1090_v25 = vrot.slane %v2631_v7, %v2381_v59  ;;  %v1141_v24 = vmul.f32 %v2609_v53, %v1082_v61 }
  0xcf   :  { %v986_v23 = vmul.f32 %v985_v3, %v979_v39  ;;  %v1246_v12 = vrot.slane %v2488_v16, %v2502_v58  ;;  %v1339_v19 = vmul.f32 %v2614_v18, %v1238_v42  ;;  %v1368_v57 = vadd.f32 %v1367_v47, %v1337_v45  ;;  %v2663_v3 = vld [vmem:[#allocation2 + $0xd8] sm:$0xff] }
  0xd0   :  { %v1170_v55 = vadd.f32 %v1169_v21, %v1139_v11  ;;  %v1094_v14 = vrot.slane %v2640_v20, %v2381_v59  ;;  %v1142_v63 = vmul.f32 %v2619_v62, %v1086_v9  ;;  %1690 = vrcp.f32 %v2927_v43 }
  0xd1   :  { %v987_v22 = vmul.f32 %v986_v23, %v2562_v40  ;;  %v1250_v32 = vrot.slane %v2498_v48, %v2502_v58  ;;  %v1340_v15 = vmul.f32 %v2625_v51, %v1242_v44  ;;  %v1369_v28 = vadd.f32 %v1368_v57, %v1338_v5 }
  0xd2   :  { %v1171_v33 = vadd.f32 %v1170_v55, %v1140_v27  ;;  %v1098_v39 = vrot.slane %v2652_v2, %v2381_v59  ;;  %v1143_v61 = vmul.f32 %v2631_v7, %v1090_v25  ;;  %v1254_v11 = vrot.slane %v2514_v0, %v2502_v58  ;;  %v2675_v25 = vld [vmem:[#allocation2 + $0xe8] sm:$0xff] }
  0xd3   :  { %v989_v40 = vsel %vm988_vm3, %v987_v22, 0.0  ;;  %v1341_v45 = vmul.f32 %v2488_v16, %v1246_v12  ;;  %v1370_v35 = vadd.f32 %v1369_v28, %v1339_v19  ;;  %v1102_v9 = vrot.slane %v2663_v3, %v2381_v59  ;;  %2969 = vst [vmem:[#allocation20_spill] sm:$0xff] %v2675_v25 }
  0xd4   :  { %v2660_v31 = vadd.f32 %v989_v40, %v2474_v10  ;;  %v1172_v42 = vadd.f32 %v1171_v33, %v1141_v24  ;;  %v1144_v27 = vmul.f32 %v2640_v20, %v1094_v14  ;;  %v1258_v44 = vrot.slane %v2523_v56, %v2502_v58  ;;  %v2671_v10 = vld [vmem:[#allocation2 + $0xe0] sm:$0xff] }
  0xd5   :  { %v1342_v5 = vmul.f32 %v2498_v48, %v1250_v32  ;;  %v1371_v47 = vadd.f32 %v1370_v35, %v1340_v15  ;;  %2968 = vst [vmem:[#allocation15_spill] sm:$0xff] %v2671_v10  ;;  %v1106_v23 = vrot.slane %v2671_v10, %v2381_v59  ;;  %v1110_v24 = vrot.slane %v2675_v25, %v2381_v59  ;;  %v2690_v32 = vld [vmem:[#allocation2 + $0xf8] sm:$0xff] }
  0xd6   :  { %v1173_v21 = vadd.f32 %v1172_v42, %v1142_v63  ;;  %v1145_v55 = vmul.f32 %v2652_v2, %v1098_v39  ;;  %v2681_v12 = vsub.s32 7, %v2957_v41  ;;  %v1262_v57 = vrot.slane %v2510_v38, %v2502_v58  ;;  %v2686_v63 = vld [vmem:[#allocation2 + $0xf0] sm:$0xff] }
  0xd7   :  { %v1343_v22 = vmul.f32 %v2514_v0, %v1254_v11  ;;  %v1372_v14 = vadd.f32 %v1371_v47, %v1341_v45  ;;  %v1114_v33 = vrot.slane %v2686_v63, %v2381_v59  ;;  %v1118_v15 = vrot.slane %v2690_v32, %v2381_v59 }
  0xd8   :  { %v1174_v19 = vadd.f32 %v1173_v21, %v1143_v61  ;;  %v1146_v28 = vmul.f32 %v2663_v3, %v1102_v9  ;;  %v1266_v39 = vrot.slane %v2519_v34, %v2502_v58  ;;  %v1344_v61 = vmul.f32 %v2523_v56, %v1258_v44 }
  0xd9   :  { %v1373_v11 = vadd.f32 %v1372_v14, %v1342_v5  ;;  %v1147_v45 = vmul.f32 %v2671_v10, %v1106_v23  ;;  %v1148_v35 = vmul.f32 %v2675_v25, %v1110_v24  ;;  %v1418_v21 = vrot.slane %v2526_v6, %v2681_v12 }
  0xda   :  { %v1175_v40 = vadd.f32 %v1174_v19, %v1144_v27  ;;  %v1691_v42 = vpop.eup %1690  ;;  %v1422_v47 = vrot.slane %v2530_v1, %v2681_v12  ;;  %v1270_v9 = vrot.slane %v2538_v13, %v2502_v58  ;;  %v1345_v27 = vmul.f32 %v2510_v38, %v1262_v57 }
  0xdb   :  { %v1374_v19 = vadd.f32 %v1373_v11, %v1343_v22  ;;  %v1149_v44 = vmul.f32 %v2686_v63, %v1114_v33  ;;  %v1150_v5 = vmul.f32 %v2690_v32, %v1118_v15  ;;  %v1274_v23 = vrot.slane %v2548_v49, %v2502_v58 }
  0xdc   :  { %v1176_v43 = vadd.f32 %v1175_v40, %v1145_v55  ;;  %v1426_v24 = vrot.slane %v2543_v30, %v2681_v12  ;;  %v2970_v25 = vmax.f32 %v2602_v50, 1e-16  ;;  %v1346_v40 = vmul.f32 %v2519_v34, %v1266_v39 }
  0xdd   :  { %v1375_v10 = vadd.f32 %v1374_v19, %v1344_v61  ;;  %v1195_v57 = vrot.slane %v2965_v4, %v2381_v59  ;;  %v1430_v22 = vrot.slane %v2553_v60, %v2681_v12  ;;  %v1543_v33 = vmul.f32 %v2526_v6, %v1418_v21 }
  0xde   :  { %v1177_v14 = vadd.f32 %v1176_v43, %v1146_v28  ;;  %v1189_v55 = vmul.f32 %v1691_v42, %v2970_v25  ;;  %v1544_v15 = vmul.f32 %v2530_v1, %v1422_v47  ;;  %v1278_v43 = vrot.slane %v2564_v17, %v2502_v58 }
  0xdf   :  { %v1347_v50 = vmul.f32 %v2538_v13, %v1270_v9  ;;  %v1376_v25 = vadd.f32 %v1375_v10, %v1345_v27  ;;  %v1282_v28 = vrot.slane %v2574_v26, %v2502_v58  ;;  %v1397_v59 = vrot.slane %v2966_v46, %v2502_v58 }
  0xe0   :  { %v1178_v11 = vadd.f32 %v1177_v14, %v1147_v45  ;;  %v1434_v4 = vrot.slane %v2569_v54, %v2681_v12  ;;  %v1545_v6 = vmul.f32 %v2543_v30, %v1426_v24  ;;  %v1190_v1 = vsub.f32 2.0, %v1189_v55 }
  0xe1   :  { %v1348_v61 = vmul.f32 %v2548_v49, %v1274_v23  ;;  %v1377_v45 = vadd.f32 %v1376_v25, %v1346_v40  ;;  %v1286_v21 = vrot.slane %v2586_v37, %v2502_v58  ;;  %v1438_v10 = vrot.slane %v2581_v8, %v2681_v12 }
  0xe2   :  { %v1179_v39 = vadd.f32 %v1178_v11, %v1148_v35  ;;  %v1546_v47 = vmul.f32 %v2553_v60, %v1430_v22  ;;  %v1575_v9 = vadd.f32 %v1544_v15, %v1543_v33  ;;  %v1290_v19 = vrot.slane %v2596_v36, %v2502_v58  ;;  %v2748_v22 = vld [vmem:[#allocation5] sm:$0xff] }
  0xe3   :  { %v1349_v30 = vmul.f32 %v2564_v17, %v1278_v43  ;;  %v1378_v35 = vadd.f32 %v1377_v45, %v1347_v50  ;;  %v2742_v24 = vmul.f32 %v1397_v59, %v2966_v46  ;;  %v1442_v23 = vrot.slane %v2591_v52, %v2681_v12 }
  0xe4   :  { %v1180_v27 = vadd.f32 %v1179_v39, %v1149_v44  ;;  %v1547_v14 = vmul.f32 %v2569_v54, %v1434_v4  ;;  %v1576_v55 = vadd.f32 %v1575_v9, %v1545_v6  ;;  %v1191_v11 = vmul.f32 %v1691_v42, %v1190_v1 }
  0xe5   :  { %v1350_v60 = vmul.f32 %v2574_v26, %v1282_v28  ;;  %v1379_v44 = vadd.f32 %v1378_v35, %v1348_v61  ;;  %v1196_v33 = vmul.f32 %v2748_v22, %v1195_v57  ;;  %v1446_v15 = vrot.slane %v2604_v29, %v2681_v12 }
  0xe6   :  { %v1181_v40 = vadd.f32 %v1180_v27, %v1150_v5  ;;  %v1548_v43 = vmul.f32 %v2581_v8, %v1438_v10  ;;  %v1577_v50 = vadd.f32 %v1576_v55, %v1546_v47  ;;  %v1294_v54 = vrot.slane %v2609_v53, %v2502_v58 }
  0xe7   :  { %v1351_v5 = vmul.f32 %v2586_v37, %v1286_v21  ;;  %v1380_v42 = vadd.f32 %v1379_v44, %v1349_v30  ;;  %v1399_v28 = vmax.f32 %v2742_v24, 1e-16  ;;  %v1450_v59 = vrot.slane %v2614_v18, %v2681_v12 }
  0xe8   :  { %v1197_v25 = vmul.f32 %v1181_v40, %v1181_v40  ;;  %v1549_v57 = vmul.f32 %v2591_v52, %v1442_v23  ;;  %v1578_v4 = vadd.f32 %v1577_v50, %v1547_v14  ;;  %v1298_v8 = vrot.slane %v2619_v62, %v2502_v58 }
  0xe9   :  { %v1352_v39 = vmul.f32 %v2596_v36, %v1290_v19  ;;  %v1381_v1 = vadd.f32 %v1380_v42, %v1350_v60  ;;  %vm1200_vm4 = vcmp.lt.s32.totalorder %v2957_v41, 5  ;;  %v1454_v61 = vrot.slane %v2625_v51, %v2681_v12  ;;  %v2971_v42 = vld [vmem:[#allocation15_spill] sm:$0xff] }
  0xea   :  { %v1198_v6 = vmul.f32 %v1197_v25, %v1191_v11  ;;  %v1550_v45 = vmul.f32 %v2604_v29, %v1446_v15  ;;  %v1579_v21 = vadd.f32 %v1578_v4, %v1548_v43  ;;  %v1302_v52 = vrot.slane %v2631_v7, %v2502_v58 }
  0xeb   :  { %v1353_v47 = vmul.f32 %v2609_v53, %v1294_v54  ;;  %v1382_v9 = vadd.f32 %v1381_v1, %v1351_v5  ;;  %1692 = vrcp.f32 %v1399_v28  ;;  %v1458_v27 = vrot.slane %v2488_v16, %v2681_v12 }
  0xec   :  { %v1199_v10 = vmul.f32 %v1198_v6, %v1196_v33  ;;  %v1551_v19 = vmul.f32 %v2614_v18, %v1450_v59  ;;  %v1580_v30 = vadd.f32 %v1579_v21, %v1549_v57  ;;  %v1306_v24 = vrot.slane %v2640_v20, %v2502_v58 }
  0xed   :  { %v1354_v29 = vmul.f32 %v2619_v62, %v1298_v8  ;;  %v1383_v23 = vadd.f32 %v1382_v9, %v1352_v39  ;;  %v1462_v55 = vrot.slane %v2498_v48, %v2681_v12  ;;  %v1552_v40 = vmul.f32 %v2625_v51, %v1454_v61  ;;  %v2972_v39 = vld [vmem:[#allocation20_spill] sm:$0xff] }
  0xee   :  { %v1201_v35 = vsel %vm1200_vm4, %v1199_v10, 0.0  ;;  %v1581_v11 = vadd.f32 %v1580_v30, %v1550_v45  ;;  %v1310_v18 = vrot.slane %v2652_v2, %v2502_v58  ;;  %v1355_v60 = vmul.f32 %v2631_v7, %v1302_v52 }
  0xef   :  { %v2778_v14 = vadd.f32 %v1201_v35, %v2660_v31  ;;  %v1384_v44 = vadd.f32 %v1383_v23, %v1353_v47  ;;  %v1466_v33 = vrot.slane %v2514_v0, %v2681_v12  ;;  %v1553_v15 = vmul.f32 %v2488_v16, %v1458_v27 }
  0xf0   :  { %v1582_v43 = vadd.f32 %v1581_v11, %v1551_v19  ;;  %v1314_v31 = vrot.slane %v2663_v3, %v2502_v58  ;;  %v1356_v50 = vmul.f32 %v2640_v20, %v1306_v24  ;;  %v1470_v51 = vrot.slane %v2523_v56, %v2681_v12 }
  0xf1   :  { %v1385_v25 = vadd.f32 %v1384_v44, %v1354_v29  ;;  %v1554_v54 = vmul.f32 %v2498_v48, %v1462_v55  ;;  %v1318_v59 = vrot.slane %v2971_v42, %v2502_v58  ;;  %v1357_v57 = vmul.f32 %v2652_v2, %v1310_v18 }
  0xf2   :  { %v1583_v5 = vadd.f32 %v1582_v43, %v1552_v40  ;;  %v1474_v16 = vrot.slane %v2510_v38, %v2681_v12  ;;  %v1555_v6 = vmul.f32 %v2514_v0, %v1466_v33  ;;  %v1322_v1 = vrot.slane %v2972_v39, %v2502_v58 }
  0xf3   :  { %v1386_v4 = vadd.f32 %v1385_v25, %v1355_v60  ;;  %v1358_v61 = vmul.f32 %v2663_v3, %v1314_v31  ;;  %v1478_v21 = vrot.slane %v2519_v34, %v2681_v12  ;;  %v1556_v10 = vmul.f32 %v2523_v56, %v1470_v51 }
  0xf4   :  { %v1584_v8 = vadd.f32 %v1583_v5, %v1553_v15  ;;  %v1326_v47 = vrot.slane %v2686_v63, %v2502_v58  ;;  %v1359_v9 = vmul.f32 %v2971_v42, %v1318_v59  ;;  %v1482_v27 = vrot.slane %v2538_v13, %v2681_v12 }
  0xf5   :  { %v1387_v45 = vadd.f32 %v1386_v4, %v1356_v50  ;;  %v1693_v48 = vpop.eup %1692  ;;  %v1557_v19 = vmul.f32 %v2510_v38, %v1474_v16  ;;  %v1330_v35 = vrot.slane %v2690_v32, %v2502_v58  ;;  %v1360_v24 = vmul.f32 %v2972_v39, %v1322_v1 }
  0xf6   :  { %v1585_v52 = vadd.f32 %v1584_v8, %v1554_v54  ;;  %v1401_v56 = vmul.f32 %v1693_v48, %v1399_v28  ;;  %v1486_v23 = vrot.slane %v2548_v49, %v2681_v12  ;;  %v1558_v55 = vmul.f32 %v2519_v34, %v1478_v21 }
  0xf7   :  { %v1388_v0 = vadd.f32 %v1387_v45, %v1357_v57  ;;  %v1361_v11 = vmul.f32 %v2686_v63, %v1326_v47  ;;  %v1490_v38 = vrot.slane %v2564_v17, %v2681_v12  ;;  %v1559_v60 = vmul.f32 %v2538_v13, %v1482_v27 }
  0xf8   :  { %v1586_v30 = vadd.f32 %v1585_v52, %v1555_v6  ;;  %v1362_v33 = vmul.f32 %v2690_v32, %v1330_v35  ;;  %v1402_v43 = vsub.f32 2.0, %v1401_v56  ;;  %v1609_v28 = vrot.slane %v2966_v46, %v2681_v12 }
  0xf9   :  { %v1389_v29 = vadd.f32 %v1388_v0, %v1358_v61  ;;  %v1494_v34 = vrot.slane %v2574_v26, %v2681_v12  ;;  %v1560_v31 = vmul.f32 %v2548_v49, %v1486_v23  ;;  %v1407_v51 = vrot.slane %v2748_v22, %v2502_v58 }
  0xfa   :  { %v1587_v40 = vadd.f32 %v1586_v30, %v1556_v10  ;;  %v1498_v13 = vrot.slane %v2586_v37, %v2681_v12  ;;  %v1561_v54 = vmul.f32 %v2564_v17, %v1490_v38  ;;  %v1403_v57 = vmul.f32 %v1693_v48, %v1402_v43 }
  0xfb   :  { %v1390_v18 = vadd.f32 %v1389_v29, %v1359_v9  ;;  %v1610_v4 = vmul.f32 %v1609_v28, %v2966_v46  ;;  %v1502_v16 = vrot.slane %v2596_v36, %v2681_v12  ;;  %v1562_v49 = vmul.f32 %v2574_v26, %v1494_v34 }
  0xfc   :  { %v1588_v44 = vadd.f32 %v1587_v40, %v1557_v19  ;;  %v1408_v8 = vmul.f32 %v2748_v22, %v1407_v51  ;;  %v1633_v58 = vrot.slane %v2748_v22, 4  ;;  %v1506_v61 = vrot.slane %v2609_v53, %v2681_v12 }
  0xfd   :  { %v1391_v15 = vadd.f32 %v1390_v18, %v1360_v24  ;;  %v1563_v17 = vmul.f32 %v2586_v37, %v1498_v13  ;;  %v1639_v46 = vmul.f32 %v2748_v22, %v2748_v22  ;;  %v1611_v21 = vmax.f32 %v1610_v4, 1e-16 }
  0xfe   :  { %v1589_v50 = vadd.f32 %v1588_v44, %v1558_v55  ;;  %vm1412_vm5 = vcmp.lt.s32.totalorder %v2957_v41, 6  ;;  %v1510_v26 = vrot.slane %v2619_v62, %v2681_v12  ;;  %v1564_v10 = vmul.f32 %v2596_v36, %v1502_v16 }
  0xff   :  { %v1392_v25 = vadd.f32 %v1391_v15, %v1361_v11  ;;  %v1514_v9 = vrot.slane %v2631_v7, %v2681_v12  ;;  %v1565_v37 = vmul.f32 %v2609_v53, %v1506_v61  ;;  %v1634_v27 = vadd.f32 %v2748_v22, %v1633_v58 }
 0x100   :  { %v1590_v5 = vadd.f32 %v1589_v50, %v1559_v60  ;;  %v1640_v19 = vrot.slane %v1639_v46, 4  ;;  %1694 = vrcp.f32 %v1611_v21  ;;  %v1518_v24 = vrot.slane %v2640_v20, %v2681_v12 }
 0x101   :  { %v1393_v59 = vadd.f32 %v1392_v25, %v1362_v33  ;;  %v1566_v36 = vmul.f32 %v2619_v62, %v1510_v26  ;;  %v1522_v56 = vrot.slane %v2652_v2, %v2681_v12  ;;  %v1567_v23 = vmul.f32 %v2631_v7, %v1514_v9 }
 0x102   :  { %v1591_v6 = vadd.f32 %v1590_v5, %v1560_v31  ;;  %v1635_v55 = vrot.slane %v1634_v27, 2  ;;  %v1641_v40 = vadd.f32 %v1640_v19, %v1639_v46  ;;  %v1526_v11 = vrot.slane %v2663_v3, %v2681_v12  ;;  %v1657_v19 = vld [vmem:[#allocation7] sm:$0x1] }
 0x103   :  { %v1409_v1 = vmul.f32 %v1393_v59, %v1393_v59  ;;  %v1568_v18 = vmul.f32 %v2640_v20, %v1518_v24  ;;  %v1530_v38 = vrot.slane %v2971_v42, %v2681_v12  ;;  %v1569_v62 = vmul.f32 %v2652_v2, %v1522_v56 }
 0x104   :  { %v1592_v45 = vadd.f32 %v1591_v6, %v1561_v54  ;;  %v1636_v44 = vadd.f32 %v1635_v55, %v1634_v27  ;;  %v1642_v33 = vrot.slane %v1641_v40, 2  ;;  %v1534_v7 = vrot.slane %v2972_v39, %v2681_v12 }
 0x105   :  { %v1410_v48 = vmul.f32 %v1409_v1, %v1403_v57  ;;  %v1570_v15 = vmul.f32 %v2663_v3, %v1526_v11  ;;  %v1538_v34 = vrot.slane %v2686_v63, %v2681_v12  ;;  %v1571_v20 = vmul.f32 %v2971_v42, %v1530_v38 }
 0x106   :  { %v1593_v52 = vadd.f32 %v1592_v45, %v1562_v49  ;;  %v1637_v50 = vrot.slane %v1636_v44, 1  ;;  %v1643_v25 = vadd.f32 %v1642_v33, %v1641_v40  ;;  %v1542_v2 = vrot.slane %v2690_v32, %v2681_v12 }
 0x107   :  { %v1411_v47 = vmul.f32 %v1410_v48, %v1408_v8  ;;  %v1572_v51 = vmul.f32 %v2972_v39, %v1534_v7  ;;  %v1573_v5 = vmul.f32 %v2686_v63, %v1538_v34  ;;  %v1619_v6 = vrot.slane %v2748_v22, %v2681_v12 }
 0x108   :  { %v1594_v0 = vadd.f32 %v1593_v52, %v1563_v17  ;;  %v1638_v59 = vadd.f32 %v1637_v50, %v1636_v44  ;;  %v1644_v57 = vrot.slane %v1643_v25, 1  ;;  %v1574_v4 = vmul.f32 %v2690_v32, %v1542_v2 }
 0x109   :  { %v1413_v30 = vsel %vm1412_vm5, %v1411_v47, 0.0  ;;  %v1620_v39 = vmul.f32 %v2748_v22, %v1619_v6  ;;  %vm1624_vm6 = vcmp.lt.s32.totalorder %v2957_v41, 7  ;;  %v2973_v47 = vlaneseq }
 0x10a   :  { %v1414_v35 = vadd.f32 %v1413_v30, %v2778_v14  ;;  %v1595_v29 = vadd.f32 %v1594_v0, %v1564_v10  ;;  %v1695_v28 = vpop.eup %1694  ;;  %v1645_v8 = vadd.f32 %v1644_v57, %v1643_v25  ;;  %v1646_v1 = vmul.f32 %v1638_v59, %v1638_v59 }
 0x10b   :  { %v1613_v54 = vmul.f32 %v1695_v28, %v1611_v21  ;;  %v46_v9 = vand.u32 127, %v2973_v47 }
 0x10c   :  { %v1596_v53 = vadd.f32 %v1595_v29, %v1565_v37  ;;  %v1647_v45 = vsub.f32 %v1646_v1, %v1645_v8 }
 0x10d   :  { %v1614_v49 = vsub.f32 2.0, %v1613_v54  ;;  %vm1653_vm7 = vcmp.lt.s32.totalorder %v46_v9, 2 }
 0x10e   :  { %v1597_v14 = vadd.f32 %v1596_v53, %v1566_v36  ;;  %v1648_v48 = vmul.f32 0.5, %v1647_v45 }
 0x10f   :  { %v1615_v61 = vmul.f32 %v1695_v28, %v1614_v49 }
 0x110   :  { %v1598_v60 = vadd.f32 %v1597_v14, %v1567_v23  ;;  %1696 = vrcp.f32 %v1648_v48 }
 0x112   :  { %v1599_v43 = vadd.f32 %v1598_v60, %v1568_v18 }
 0x114   :  { %v1600_v31 = vadd.f32 %v1599_v43, %v1569_v62 }
 0x116   :  { %v1601_v13 = vadd.f32 %v1600_v31, %v1570_v15 }
 0x118   :  { %v1602_v3 = vadd.f32 %v1601_v13, %v1571_v20 }
 0x11a   :  { %v1603_v16 = vadd.f32 %v1602_v3, %v1572_v51  ;;  %v1697_v0 = vpop.eup %1696 }
 0x11c   :  { %v1604_v42 = vadd.f32 %v1603_v16, %v1573_v5 }
 0x11e   :  { %v1605_v58 = vadd.f32 %v1604_v42, %v1574_v4 }
 0x120   :  { %v1621_v17 = vmul.f32 %v1605_v58, %v1605_v58 }
 0x122   :  { %v1622_v63 = vmul.f32 %v1621_v17, %v1615_v61 }
 0x124   :  { %v1623_v46 = vmul.f32 %v1622_v63, %v1620_v39 }
 0x126   :  { %v1625_v32 = vsel %vm1624_vm6, %v1623_v46, 0.0 }
 0x127   :  { %v1626_v21 = vadd.f32 %v1625_v32, %v1414_v35 }
 0x129   :  { %v1627_v26 = vrot.slane %v1626_v21, 4 }
 0x12b   :  { %v1628_v10 = vadd.f32 %v1627_v26, %v1626_v21 }
 0x12d   :  { %v1629_v52 = vrot.slane %v1628_v10, 2 }
 0x12f   :  { %v1630_v12 = vadd.f32 %v1629_v52, %v1628_v10 }
 0x131   :  { %v1631_v37 = vrot.slane %v1630_v12, 1 }
 0x133   :  { %v1632_v27 = vadd.f32 %v1631_v37, %v1630_v12 }
 0x135   :  { %v1655_v22 = vmul.f32 %v1697_v0, %v1632_v27 }
 0x137   :  { %v1656_v41 = vsel %vm1653_vm7, %v1655_v22, 0.0 }
 0x138   :  { %v1658_v30 = vadd.f32 %v1657_v19, %v1656_v41 }
 0x13a   :  { %1659 = vst [vmem:[#allocation7] sm:$0x1] %v1658_v30 }
 0x13b   :  { %1786 = shalt.err (!%p1783_p6)
}
 0x13c   :  { %s1787_s11 = scalar_lea.hbm %s2896_s2, 16 }
 0x13d   :  { %p1788_p7 = scmp.ne.s32.totalorder %s2896_s2, %s1787_s11  ;;  %p1791_p8 = scmp.lt.u32.totalorder %s1787_s11, %s2896_s2 }
 0x13f   :  { %p1793_p9 = pnand %p1791_p8, %p1788_p7 }
 0x141   :  { %1796 = shalt.err (!%p1793_p9)
}
 0x142   :  { %1669 = dma.vmem_to_hbm [thread:$0]  %s1667_s6, 16, %s2896_s2, [#allocation4]  }
 0x143   :  { %1801 = dma.done.wait [#allocation4], 16  }
 0x144   :  { %1802 = vsyncadd [#allocation4], 4294967280 }
 0x145   :  { %1673 = vsyncpa [#allocation3], 1 }
 0x146   :  { %1674 = vsyncpa [#allocation6], 1 }
 0x147   :  { %1675 = vsyncpa [#allocation4], 1 }

</bundles_post_ra>
